<compile_context>
chip_gen: v6e
topology: v6e:2x2x1
jax: 0.10.0
libtpu: 0.0.40
codegen_flags: <defaults>
</compile_context>

<pallas_src>
import functools

import jax
import jax.numpy as jnp
from jax.experimental import pallas as pl
from jax.experimental.pallas import tpu as pltpu

_EPS = 1e-3  # BatchNorm2d eps=0.001 in the PyTorch module


# ----------------------------- Pallas kernel --------------------------------
def _bottleneck_kernel(x_ref, xtop_ref, xbot_ref, w1_ref, s1_ref, b1_ref,
                       w2_ref, s2_ref, b2_ref, o_ref, y1p_ref, *, add):
    """One (image, row-band) grid step.

    x_ref   : (1, TH, W, C1) f32   body rows of this band
    xtop_ref: (1, 1,  W, C1) f32   row just above the band (clamped at border)
    xbot_ref: (1, 1,  W, C1) f32   row just below the band (clamped at border)
    w1_ref  : (C1, C_)       bf16  cv1 weights (1x1 conv)
    s1/b1   : (1, C_)        f32   folded BN scale / shift for cv1
    w2_ref  : (3, 3, C_, C2) bf16  cv2 weights (3x3 conv)
    s2/b2   : (1, C2)        f32   folded BN scale / shift for cv2
    o_ref   : (1, TH, W, C2) f32   output block (also used as f32 accumulator)
    y1p_ref : (TH+2, W+2, C_) f32  zero-padded cv1 output (VMEM scratch)
    """
    _, TH, W, C1 = x_ref.shape
    C_ = w1_ref.shape[1]
    C2 = w2_ref.shape[3]

    band = pl.program_id(1)
    n_bands = pl.num_programs(1)

    w1 = w1_ref[...]                                   # (C1, C_) bf16
    s1 = s1_ref[...]                                   # (1, C_)  f32
    b1 = b1_ref[...]

    def silu(y):
        # exp + approximate reciprocal ride the EUP slot instead of the VALU.
        return y * pl.reciprocal(1.0 + jnp.exp(-y), approx=True)

    def cv1(rows_f32):
        # rows_f32: (M, C1) f32 -> (M, C_) f32 ; 1x1 conv + folded BN + SiLU
        y = jnp.dot(rows_f32.astype(jnp.bfloat16), w1,
                    preferred_element_type=jnp.float32)
        return silu(y * s1 + b1)

    # ---- cv1 on the body rows and the two halo rows of this band -----------
    y1_body = cv1(x_ref[...].reshape(TH * W, C1))                # (TH*W, C_)
    # Conv zero-padding applies to cv2's *input* (= y1), so halo rows that fall
    # outside the image must be exactly zero -> compute, then mask.
    top_keep = jnp.where(band > 0, 1.0, 0.0)
    bot_keep = jnp.where(band < n_bands - 1, 1.0, 0.0)
    y1_top = cv1(xtop_ref[...].reshape(W, C1)) * top_keep        # (W, C_)
    y1_bot = cv1(xbot_ref[...].reshape(W, C1)) * bot_keep        # (W, C_)

    # ---- assemble the zero-padded intermediate in VMEM ---------------------
    zero_col = jnp.zeros((TH + 2, 1, C_), jnp.float32)
    y1p_ref[:, 0:1, :] = zero_col                       # left  W-halo column
    y1p_ref[:, W + 1:W + 2, :] = zero_col               # right W-halo column
    y1p_ref[0:1, 1:W + 1, :] = y1_top.reshape(1, W, C_)
    y1p_ref[1:TH + 1, 1:W + 1, :] = y1_body.reshape(TH, W, C_)
    y1p_ref[TH + 1:TH + 2, 1:W + 1, :] = y1_bot.reshape(1, W, C_)

    # ---- cv2: 3x3 conv as 9 shifted matmuls, accumulated in the out block --
    first = True
    for dh in range(3):
        for dw in range(3):
            win = y1p_ref[dh:dh + TH, dw:dw + W, :].reshape(TH * W, C_)
            part = jnp.dot(win.astype(jnp.bfloat16), w2_ref[dh, dw, :, :],
                           preferred_element_type=jnp.float32)
            part = part.reshape(1, TH, W, C2)
            if first:
                o_ref[...] = part
                first = False
            else:
                o_ref[...] += part

    # ---- cv2 epilogue: folded BN + SiLU (+ residual) ------------------------
    y2 = o_ref[...] * s2_ref[...].reshape(1, 1, 1, C2) \
        + b2_ref[...].reshape(1, 1, 1, C2)
    y2 = silu(y2)
    if add:
        y2 = y2 + x_ref[...]        # re-read x from VMEM only here (residual)
    o_ref[...] = y2


# ------------------------------ tiling helpers -------------------------------
def _vmem_estimate(tile_h, W, C1, C_, C2):
    """Rough per-step VMEM footprint in bytes (inputs/outputs double-buffered)."""
    f32, bf16 = 4, 2
    io = 2 * ((tile_h + 2) * W * C1 * f32 + tile_h * W * C2 * f32)
    scratch = (tile_h + 2) * (W + 2) * C_ * f32
    weights = C1 * C_ * bf16 + 9 * C_ * C2 * bf16 + 2 * (C_ + C2) * f32
    return io + scratch + 2 * weights


def _pick_tile_h(H, W, C1, C_, C2, budget=8 << 20):
    """Largest divisor of H whose working set stays within `budget` bytes
    (conservative so the same tiling also fits v7x's 64 MiB VMEM)."""
    best = 1
    for t in range(1, H + 1):
        if H % t == 0 and (t == 1 or _vmem_estimate(t, W, C1, C_, C2) <= budget):
            best = t
    return best


# -------------------------------- wrappers -----------------------------------
def cspnext_bottleneck_nhwc(x_nhwc, kparams, *, shortcut=True, tile_h=None):
    """x_nhwc: (N, H, W, C1) float32.  Returns (N, H, W, C2) float32."""
    w1, s1, b1, w2, s2, b2 = kparams
    N, H, W, C1 = x_nhwc.shape
    C_ = w1.shape[1]
    C2 = w2.shape[3]
    add = bool(shortcut and (C1 == C2))

    if tile_h is None:
        tile_h = _pick_tile_h(H, W, C1, C_, C2)
    if H % tile_h != 0:
        raise ValueError(f"tile_h={tile_h} must divide H={H}")
    n_bands = H // tile_h

    def body_map(n, i):
        return (n, i, 0, 0)

    def top_map(n, i):        # block height 1 -> block index == row index
        return (n, jnp.maximum(i * tile_h - 1, 0), 0, 0)

    def bot_map(n, i):
        return (n, jnp.minimum((i + 1) * tile_h, H - 1), 0, 0)

    const4 = lambda n, i: (0, 0, 0, 0)
    const2 = lambda n, i: (0, 0)

    est = _vmem_estimate(tile_h, W, C1, C_, C2)
    vmem_limit = int(min(max(2 * est + (4 << 20), 16 << 20), 48 << 20))

    kernel = functools.partial(_bottleneck_kernel, add=add)
    return pl.pallas_call(
        kernel,
        out_shape=jax.ShapeDtypeStruct((N, H, W, C2), jnp.float32),
        grid=(N, n_bands),
        in_specs=[
            pl.BlockSpec((1, tile_h, W, C1), body_map),   # x, body rows
            pl.BlockSpec((1, 1, W, C1), top_map),         # x, top halo row
            pl.BlockSpec((1, 1, W, C1), bot_map),         # x, bottom halo row
            pl.BlockSpec((C1, C_), const2),               # w1
            pl.BlockSpec((1, C_), const2),                # s1
            pl.BlockSpec((1, C_), const2),                # b1
            pl.BlockSpec((3, 3, C_, C2), const4),         # w2
            pl.BlockSpec((1, C2), const2),                # s2
            pl.BlockSpec((1, C2), const2),                # b2
        ],
        out_specs=pl.BlockSpec((1, tile_h, W, C2), body_map),
        scratch_shapes=[pltpu.VMEM((tile_h + 2, W + 2, C_), jnp.float32)],
        compiler_params=pltpu.CompilerParams(
            dimension_semantics=("parallel", "parallel"),
            vmem_limit_bytes=vmem_limit),
    )(x_nhwc, x_nhwc, x_nhwc, w1, s1, b1, w2, s2, b2)


def cspnext_bottleneck_nchw(x_nchw, kparams, *, shortcut=True, tile_h=None):
    """PyTorch-layout convenience wrapper.  Production callers should feed
    NHWC directly (cspnext_bottleneck_nhwc) to avoid these two extra
    HBM-roundtrip transposes."""
    x_nhwc = jnp.transpose(x_nchw, (0, 2, 3, 1)).astype(jnp.float32)
    out = cspnext_bottleneck_nhwc(x_nhwc, kparams, shortcut=shortcut,
                                  tile_h=tile_h)
    return jnp.transpose(out, (0, 3, 1, 2))


# --------------------------- parameter construction -------------------------
def make_raw_params(key, c1, c2, e=0.5):
    """Deterministic synthetic parameters matching the PyTorch module shapes."""
    c_ = int(c2 * e)
    ks = jax.random.split(key, 10)
    w1 = jax.random.normal(ks[0], (c_, c1, 1, 1), jnp.float32) * 0.3   # OIHW
    g1 = jax.random.uniform(ks[1], (c_,), minval=0.5, maxval=1.5)
    b1 = jax.random.normal(ks[2], (c_,), dtype=jnp.float32) * 0.1
    m1 = jax.random.normal(ks[3], (c_,), dtype=jnp.float32) * 0.1
    v1 = jax.random.uniform(ks[4], (c_,), minval=0.5, maxval=1.5)
    w2 = jax.random.normal(ks[5], (c2, c_, 3, 3), jnp.float32) * 0.3   # OIHW
    g2 = jax.random.uniform(ks[6], (c2,), minval=0.5, maxval=1.5)
    b2 = jax.random.normal(ks[7], (c2,), dtype=jnp.float32) * 0.1
    m2 = jax.random.normal(ks[8], (c2,), dtype=jnp.float32) * 0.1
    v2 = jax.random.uniform(ks[9], (c2,), minval=0.5, maxval=1.5)
    return (w1, g1, b1, m1, v1, w2, g2, b2, m2, v2)


def to_kernel_params(raw):
    """Fold BN into per-channel scale/shift; reorder + bf16-cast conv weights."""
    w1, g1, b1, m1, v1, w2, g2, b2, m2, v2 = raw
    s1 = g1 / jnp.sqrt(v1 + _EPS)
    sh1 = b1 - m1 * s1
    s2 = g2 / jnp.sqrt(v2 + _EPS)
    sh2 = b2 - m2 * s2
    c_ = w1.shape[0]
    c2 = w2.shape[0]
    w1_k = jnp.transpose(w1[:, :, 0, 0], (1, 0)).astype(jnp.bfloat16)   # (C1, C_)
    w2_k = jnp.transpose(w2, (2, 3, 1, 0)).astype(jnp.bfloat16)         # (3,3,C_,C2)
    return (w1_k,
            s1.reshape(1, c_).astype(jnp.float32),
            sh1.reshape(1, c_).astype(jnp.float32),
            w2_k,
            s2.reshape(1, c2).astype(jnp.float32),
            sh2.reshape(1, c2).astype(jnp.float32))


# ------------------------------ pure-JAX reference --------------------------
def ref_forward(x, raw, *, shortcut=True):
    w1, g1, b1, m1, v1, w2, g2, b2, m2, v2 = raw

    def conv(inp, w, pad):
        return jax.lax.conv_general_dilated(
            inp, w, window_strides=(1, 1), padding=[(pad, pad), (pad, pad)],
            dimension_numbers=('NCHW', 'OIHW', 'NCHW'))

    def bn(y, g, b, m, v):
        rsh = lambda t: t.reshape(1, -1, 1, 1)
        return (y - rsh(m)) / jnp.sqrt(rsh(v) + _EPS) * rsh(g) + rsh(b)

    def silu(y):
        return y * jax.nn.sigmoid(y)

    y = silu(bn(conv(x, w1, 0), g1, b1, m1, v1))
    y = silu(bn(conv(y, w2, 1), g2, b2, m2, v2))
    add = shortcut and (x.shape[1] == w2.shape[0])
    return x + y if add else y


def _check(out, ref, tag):
    assert out.shape == ref.shape, (tag, out.shape, ref.shape)
    err = jnp.abs(out - ref)
    max_err = float(jnp.max(err))
    mean_err = float(jnp.mean(err))
    ok = bool(jnp.allclose(out, ref, atol=5e-2, rtol=5e-2)) and mean_err < 1e-2
    if not ok:
        raise AssertionError(
            f"[{tag}] Pallas kernel mismatch vs reference: "
            f"max |err| = {max_err}, mean |err| = {mean_err}")


if __name__ == "__main__":
    N, C1, C2, H, W = 2, 4, 4, 16, 16   # c1 == c2 -> residual add is active
    key = jax.random.PRNGKey(0)
    kx, kp = jax.random.split(key)

    x = jax.random.normal(kx, (N, C1, H, W), jnp.float32)
    raw = make_raw_params(kp, C1, C2, e=0.5)
    kparams = to_kernel_params(raw)

    ref = ref_forward(x, raw, shortcut=True)

    # Multi-band path: exercises halo rows, including both image borders.
    out = jax.block_until_ready(
        cspnext_bottleneck_nchw(x, kparams, shortcut=True, tile_h=8))
    _check(out, ref, "tile_h=8")

    # Auto-picked tile (single band for this toy size).
    out = jax.block_until_ready(
        cspnext_bottleneck_nchw(x, kparams, shortcut=True))
    _check(out, ref, "auto tile")

    # No-residual path.
    ref_ns = ref_forward(x, raw, shortcut=False)
    out = jax.block_until_ready(
        cspnext_bottleneck_nchw(x, kparams, shortcut=False, tile_h=8))
    _check(out, ref_ns, "no shortcut")

    print("KERNEL_OK")
</pallas_src>

<mosaic_0001>
module attributes {stable_mosaic.version = 11 : i64} {
  func.func @_bottleneck_kernel(%arg0: i32, %arg1: i32, %arg2: memref<1x8x16x4xf32, #tpu.memory_space<vmem>>, %arg3: memref<1x1x16x4xf32, #tpu.memory_space<vmem>>, %arg4: memref<1x1x16x4xf32, #tpu.memory_space<vmem>>, %arg5: memref<4x2xbf16, #tpu.memory_space<vmem>>, %arg6: memref<1x2xf32, #tpu.memory_space<vmem>>, %arg7: memref<1x2xf32, #tpu.memory_space<vmem>>, %arg8: memref<3x3x2x4xbf16, #tpu.memory_space<vmem>>, %arg9: memref<1x4xf32, #tpu.memory_space<vmem>>, %arg10: memref<1x4xf32, #tpu.memory_space<vmem>>, %arg11: memref<1x8x16x4xf32, #tpu.memory_space<vmem>>, %arg12: memref<10x18x2xf32, #tpu.memory_space<vmem>>) attributes {dimension_semantics = [#tpu.dimension_semantics<parallel>, #tpu.dimension_semantics<parallel>], iteration_bounds = array<i64: 2, 2>, scalar_prefetch = 0 : i64, scratch_operands = 1 : i64, tpu.core_type = #tpu.core_type<tc>, window_params = [{transform_indices = @transform_0, window_bounds = array<i64: 1, 8, 16, 4>}, {transform_indices = @transform_1, window_bounds = array<i64: 1, 1, 16, 4>}, {transform_indices = @transform_2, window_bounds = array<i64: 1, 1, 16, 4>}, {pipeline_mode = #tpu.pipeline_mode<synchronous>, transform_indices = @transform_3, window_bounds = array<i64: 4, 2>}, {pipeline_mode = #tpu.pipeline_mode<synchronous>, transform_indices = @transform_4, window_bounds = array<i64: 1, 2>}, {pipeline_mode = #tpu.pipeline_mode<synchronous>, transform_indices = @transform_5, window_bounds = array<i64: 1, 2>}, {pipeline_mode = #tpu.pipeline_mode<synchronous>, transform_indices = @transform_6, window_bounds = array<i64: 3, 3, 2, 4>}, {pipeline_mode = #tpu.pipeline_mode<synchronous>, transform_indices = @transform_7, window_bounds = array<i64: 1, 4>}, {pipeline_mode = #tpu.pipeline_mode<synchronous>, transform_indices = @transform_8, window_bounds = array<i64: 1, 4>}, {transform_indices = @transform_9, window_bounds = array<i64: 1, 8, 16, 4>}]} {
    %c0 = arith.constant 0 : index
    %c0_0 = arith.constant 0 : index
    %0 = vector.load %arg5[%c0, %c0_0] : memref<4x2xbf16, #tpu.memory_space<vmem>>, vector<4x2xbf16>
    %c0_1 = arith.constant 0 : index
    %c0_2 = arith.constant 0 : index
    %1 = vector.load %arg6[%c0_1, %c0_2] : memref<1x2xf32, #tpu.memory_space<vmem>>, vector<1x2xf32>
    %c0_3 = arith.constant 0 : index
    %c0_4 = arith.constant 0 : index
    %2 = vector.load %arg7[%c0_3, %c0_4] : memref<1x2xf32, #tpu.memory_space<vmem>>, vector<1x2xf32>
    %c0_5 = arith.constant 0 : index
    %c0_6 = arith.constant 0 : index
    %c0_7 = arith.constant 0 : index
    %c0_8 = arith.constant 0 : index
    %3 = vector.load %arg2[%c0_5, %c0_6, %c0_7, %c0_8] : memref<1x8x16x4xf32, #tpu.memory_space<vmem>>, vector<1x8x16x4xf32>
    %4 = vector.shape_cast %3 : vector<1x8x16x4xf32> to vector<128x4xf32>
    %5 = arith.truncf %4 : vector<128x4xf32> to vector<128x4xbf16>
    %cst = arith.constant dense<0.000000e+00> : vector<128x2xf32>
    %6 = tpu.matmul %5, %0, %cst {dimension_numbers = #tpu.dot_dimension_numbers<[1], [0], [0], [1], [0, 0, 1, 1], [], []>} : vector<128x4xbf16>, vector<4x2xbf16>, vector<128x2xf32> -> vector<128x2xf32>
    %7 = vector.broadcast %1 : vector<1x2xf32> to vector<128x2xf32>
    %8 = arith.mulf %6, %7 : vector<128x2xf32>
    %9 = vector.broadcast %2 : vector<1x2xf32> to vector<128x2xf32>
    %10 = arith.addf %8, %9 : vector<128x2xf32>
    %cst_9 = arith.constant 0.000000e+00 : f32
    %11 = vector.broadcast %cst_9 : f32 to vector<128x2xf32>
    %12 = arith.subf %11, %10 : vector<128x2xf32>
    %13 = math.exp %12 : vector<128x2xf32>
    %cst_10 = arith.constant 1.000000e+00 : f32
    %14 = vector.broadcast %cst_10 : f32 to vector<128x2xf32>
    %15 = arith.addf %14, %13 : vector<128x2xf32>
    %16 = tpu.reciprocal %15 {approx = true} : vector<128x2xf32> -> vector<128x2xf32>
    %17 = arith.mulf %10, %16 : vector<128x2xf32>
    %c0_i32 = arith.constant 0 : i32
    %18 = arith.cmpi sgt, %arg1, %c0_i32 : i32
    %cst_11 = arith.constant 1.000000e+00 : f32
    %cst_12 = arith.constant 0.000000e+00 : f32
    %19 = arith.select %18, %cst_11, %cst_12 : f32
    %c1_i32 = arith.constant 1 : i32
    %20 = arith.cmpi slt, %arg1, %c1_i32 : i32
    %cst_13 = arith.constant 1.000000e+00 : f32
    %cst_14 = arith.constant 0.000000e+00 : f32
    %21 = arith.select %20, %cst_13, %cst_14 : f32
    %c0_15 = arith.constant 0 : index
    %c0_16 = arith.constant 0 : index
    %c0_17 = arith.constant 0 : index
    %c0_18 = arith.constant 0 : index
    %22 = vector.load %arg3[%c0_15, %c0_16, %c0_17, %c0_18] : memref<1x1x16x4xf32, #tpu.memory_space<vmem>>, vector<1x1x16x4xf32>
    %23 = vector.shape_cast %22 : vector<1x1x16x4xf32> to vector<16x4xf32>
    %24 = arith.truncf %23 : vector<16x4xf32> to vector<16x4xbf16>
    %cst_19 = arith.constant dense<0.000000e+00> : vector<16x2xf32>
    %25 = tpu.matmul %24, %0, %cst_19 {dimension_numbers = #tpu.dot_dimension_numbers<[1], [0], [0], [1], [0, 0, 1, 1], [], []>} : vector<16x4xbf16>, vector<4x2xbf16>, vector<16x2xf32> -> vector<16x2xf32>
    %26 = vector.broadcast %1 : vector<1x2xf32> to vector<16x2xf32>
    %27 = arith.mulf %25, %26 : vector<16x2xf32>
    %28 = vector.broadcast %2 : vector<1x2xf32> to vector<16x2xf32>
    %29 = arith.addf %27, %28 : vector<16x2xf32>
    %cst_20 = arith.constant 0.000000e+00 : f32
    %30 = vector.broadcast %cst_20 : f32 to vector<16x2xf32>
    %31 = arith.subf %30, %29 : vector<16x2xf32>
    %32 = math.exp %31 : vector<16x2xf32>
    %cst_21 = arith.constant 1.000000e+00 : f32
    %33 = vector.broadcast %cst_21 : f32 to vector<16x2xf32>
    %34 = arith.addf %33, %32 : vector<16x2xf32>
    %35 = tpu.reciprocal %34 {approx = true} : vector<16x2xf32> -> vector<16x2xf32>
    %36 = arith.mulf %29, %35 : vector<16x2xf32>
    %37 = vector.broadcast %19 : f32 to vector<16x2xf32>
    %38 = arith.mulf %36, %37 : vector<16x2xf32>
    %c0_22 = arith.constant 0 : index
    %c0_23 = arith.constant 0 : index
    %c0_24 = arith.constant 0 : index
    %c0_25 = arith.constant 0 : index
    %39 = vector.load %arg4[%c0_22, %c0_23, %c0_24, %c0_25] : memref<1x1x16x4xf32, #tpu.memory_space<vmem>>, vector<1x1x16x4xf32>
    %40 = vector.shape_cast %39 : vector<1x1x16x4xf32> to vector<16x4xf32>
    %41 = arith.truncf %40 : vector<16x4xf32> to vector<16x4xbf16>
    %cst_26 = arith.constant dense<0.000000e+00> : vector<16x2xf32>
    %42 = tpu.matmul %41, %0, %cst_26 {dimension_numbers = #tpu.dot_dimension_numbers<[1], [0], [0], [1], [0, 0, 1, 1], [], []>} : vector<16x4xbf16>, vector<4x2xbf16>, vector<16x2xf32> -> vector<16x2xf32>
    %43 = vector.broadcast %1 : vector<1x2xf32> to vector<16x2xf32>
    %44 = arith.mulf %42, %43 : vector<16x2xf32>
    %45 = vector.broadcast %2 : vector<1x2xf32> to vector<16x2xf32>
    %46 = arith.addf %44, %45 : vector<16x2xf32>
    %cst_27 = arith.constant 0.000000e+00 : f32
    %47 = vector.broadcast %cst_27 : f32 to vector<16x2xf32>
    %48 = arith.subf %47, %46 : vector<16x2xf32>
    %49 = math.exp %48 : vector<16x2xf32>
    %cst_28 = arith.constant 1.000000e+00 : f32
    %50 = vector.broadcast %cst_28 : f32 to vector<16x2xf32>
    %51 = arith.addf %50, %49 : vector<16x2xf32>
    %52 = tpu.reciprocal %51 {approx = true} : vector<16x2xf32> -> vector<16x2xf32>
    %53 = arith.mulf %46, %52 : vector<16x2xf32>
    %54 = vector.broadcast %21 : f32 to vector<16x2xf32>
    %55 = arith.mulf %53, %54 : vector<16x2xf32>
    %cst_29 = arith.constant 0.000000e+00 : f32
    %56 = vector.broadcast %cst_29 : f32 to vector<10x1x2xf32>
    %c0_30 = arith.constant 0 : index
    %c0_31 = arith.constant 0 : index
    %c0_32 = arith.constant 0 : index
    %57 = vector.load %arg12[%c0_30, %c0_31, %c0_32] : memref<10x18x2xf32, #tpu.memory_space<vmem>>, vector<10x1x2xf32>
    tpu.vector_store %arg12[%c0_30, %c0_31, %c0_32], %56 {strides = array<i32>} : memref<10x18x2xf32, #tpu.memory_space<vmem>>, vector<10x1x2xf32>,
    %c0_33 = arith.constant 0 : index
    %c17 = arith.constant 17 : index
    %c0_34 = arith.constant 0 : index
    %58 = vector.load %arg12[%c0_33, %c17, %c0_34] : memref<10x18x2xf32, #tpu.memory_space<vmem>>, vector<10x1x2xf32>
    tpu.vector_store %arg12[%c0_33, %c17, %c0_34], %56 {strides = array<i32>} : memref<10x18x2xf32, #tpu.memory_space<vmem>>, vector<10x1x2xf32>,
    %59 = vector.shape_cast %38 : vector<16x2xf32> to vector<1x16x2xf32>
    %c0_35 = arith.constant 0 : index
    %c1 = arith.constant 1 : index
    %c0_36 = arith.constant 0 : index
    %60 = vector.load %arg12[%c0_35, %c1, %c0_36] : memref<10x18x2xf32, #tpu.memory_space<vmem>>, vector<1x16x2xf32>
    tpu.vector_store %arg12[%c0_35, %c1, %c0_36], %59 {strides = array<i32>} : memref<10x18x2xf32, #tpu.memory_space<vmem>>, vector<1x16x2xf32>,
    %61 = vector.shape_cast %17 : vector<128x2xf32> to vector<8x16x2xf32>
    %c1_37 = arith.constant 1 : index
    %c1_38 = arith.constant 1 : index
    %c0_39 = arith.constant 0 : index
    %62 = vector.load %arg12[%c1_37, %c1_38, %c0_39] : memref<10x18x2xf32, #tpu.memory_space<vmem>>, vector<8x16x2xf32>
    tpu.vector_store %arg12[%c1_37, %c1_38, %c0_39], %61 {strides = array<i32>} : memref<10x18x2xf32, #tpu.memory_space<vmem>>, vector<8x16x2xf32>,
    %63 = vector.shape_cast %55 : vector<16x2xf32> to vector<1x16x2xf32>
    %c9 = arith.constant 9 : index
    %c1_40 = arith.constant 1 : index
    %c0_41 = arith.constant 0 : index
    %64 = vector.load %arg12[%c9, %c1_40, %c0_41] : memref<10x18x2xf32, #tpu.memory_space<vmem>>, vector<1x16x2xf32>
    tpu.vector_store %arg12[%c9, %c1_40, %c0_41], %63 {strides = array<i32>} : memref<10x18x2xf32, #tpu.memory_space<vmem>>, vector<1x16x2xf32>,
    %c0_42 = arith.constant 0 : index
    %c0_43 = arith.constant 0 : index
    %c0_44 = arith.constant 0 : index
    %65 = vector.load %arg12[%c0_42, %c0_43, %c0_44] : memref<10x18x2xf32, #tpu.memory_space<vmem>>, vector<8x16x2xf32>
    %66 = vector.shape_cast %65 : vector<8x16x2xf32> to vector<128x2xf32>
    %67 = arith.truncf %66 : vector<128x2xf32> to vector<128x2xbf16>
    %c0_45 = arith.constant 0 : index
    %c0_46 = arith.constant 0 : index
    %c0_47 = arith.constant 0 : index
    %c0_48 = arith.constant 0 : index
    %68 = vector.load %arg8[%c0_45, %c0_46, %c0_47, %c0_48] : memref<3x3x2x4xbf16, #tpu.memory_space<vmem>>, vector<1x1x2x4xbf16>
    %69 = vector.shape_cast %68 : vector<1x1x2x4xbf16> to vector<2x4xbf16>
    %cst_49 = arith.constant dense<0.000000e+00> : vector<128x4xf32>
    %70 = tpu.matmul %67, %69, %cst_49 {dimension_numbers = #tpu.dot_dimension_numbers<[1], [0], [0], [1], [0, 0, 1, 1], [], []>} : vector<128x2xbf16>, vector<2x4xbf16>, vector<128x4xf32> -> vector<128x4xf32>
    %71 = vector.shape_cast %70 : vector<128x4xf32> to vector<1x8x16x4xf32>
    %c0_50 = arith.constant 0 : index
    %c0_51 = arith.constant 0 : index
    %c0_52 = arith.constant 0 : index
    %c0_53 = arith.constant 0 : index
    %72 = vector.load %arg11[%c0_50, %c0_51, %c0_52, %c0_53] : memref<1x8x16x4xf32, #tpu.memory_space<vmem>>, vector<1x8x16x4xf32>
    tpu.vector_store %arg11[%c0_50, %c0_51, %c0_52, %c0_53], %71 {strides = array<i32>} : memref<1x8x16x4xf32, #tpu.memory_space<vmem>>, vector<1x8x16x4xf32>,
    %c0_54 = arith.constant 0 : index
    %c1_55 = arith.constant 1 : index
    %c0_56 = arith.constant 0 : index
    %73 = vector.load %arg12[%c0_54, %c1_55, %c0_56] : memref<10x18x2xf32, #tpu.memory_space<vmem>>, vector<8x16x2xf32>
    %74 = vector.shape_cast %73 : vector<8x16x2xf32> to vector<128x2xf32>
    %75 = arith.truncf %74 : vector<128x2xf32> to vector<128x2xbf16>
    %c0_57 = arith.constant 0 : index
    %c1_58 = arith.constant 1 : index
    %c0_59 = arith.constant 0 : index
    %c0_60 = arith.constant 0 : index
    %76 = vector.load %arg8[%c0_57, %c1_58, %c0_59, %c0_60] : memref<3x3x2x4xbf16, #tpu.memory_space<vmem>>, vector<1x1x2x4xbf16>
    %77 = vector.shape_cast %76 : vector<1x1x2x4xbf16> to vector<2x4xbf16>
    %cst_61 = arith.constant dense<0.000000e+00> : vector<128x4xf32>
    %78 = tpu.matmul %75, %77, %cst_61 {dimension_numbers = #tpu.dot_dimension_numbers<[1], [0], [0], [1], [0, 0, 1, 1], [], []>} : vector<128x2xbf16>, vector<2x4xbf16>, vector<128x4xf32> -> vector<128x4xf32>
    %79 = vector.shape_cast %78 : vector<128x4xf32> to vector<1x8x16x4xf32>
    %c0_62 = arith.constant 0 : index
    %c0_63 = arith.constant 0 : index
    %c0_64 = arith.constant 0 : index
    %c0_65 = arith.constant 0 : index
    %80 = vector.load %arg11[%c0_62, %c0_63, %c0_64, %c0_65] : memref<1x8x16x4xf32, #tpu.memory_space<vmem>>, vector<1x8x16x4xf32>
    %81 = arith.addf %80, %79 : vector<1x8x16x4xf32>
    %c0_66 = arith.constant 0 : index
    %c0_67 = arith.constant 0 : index
    %c0_68 = arith.constant 0 : index
    %c0_69 = arith.constant 0 : index
    %82 = vector.load %arg11[%c0_66, %c0_67, %c0_68, %c0_69] : memref<1x8x16x4xf32, #tpu.memory_space<vmem>>, vector<1x8x16x4xf32>
    tpu.vector_store %arg11[%c0_66, %c0_67, %c0_68, %c0_69], %81 {strides = array<i32>} : memref<1x8x16x4xf32, #tpu.memory_space<vmem>>, vector<1x8x16x4xf32>,
    %c0_70 = arith.constant 0 : index
    %c2 = arith.constant 2 : index
    %c0_71 = arith.constant 0 : index
    %83 = vector.load %arg12[%c0_70, %c2, %c0_71] : memref<10x18x2xf32, #tpu.memory_space<vmem>>, vector<8x16x2xf32>
    %84 = vector.shape_cast %83 : vector<8x16x2xf32> to vector<128x2xf32>
    %85 = arith.truncf %84 : vector<128x2xf32> to vector<128x2xbf16>
    %c0_72 = arith.constant 0 : index
    %c2_73 = arith.constant 2 : index
    %c0_74 = arith.constant 0 : index
    %c0_75 = arith.constant 0 : index
    %86 = vector.load %arg8[%c0_72, %c2_73, %c0_74, %c0_75] : memref<3x3x2x4xbf16, #tpu.memory_space<vmem>>, vector<1x1x2x4xbf16>
    %87 = vector.shape_cast %86 : vector<1x1x2x4xbf16> to vector<2x4xbf16>
    %cst_76 = arith.constant dense<0.000000e+00> : vector<128x4xf32>
    %88 = tpu.matmul %85, %87, %cst_76 {dimension_numbers = #tpu.dot_dimension_numbers<[1], [0], [0], [1], [0, 0, 1, 1], [], []>} : vector<128x2xbf16>, vector<2x4xbf16>, vector<128x4xf32> -> vector<128x4xf32>
    %89 = vector.shape_cast %88 : vector<128x4xf32> to vector<1x8x16x4xf32>
    %c0_77 = arith.constant 0 : index
    %c0_78 = arith.constant 0 : index
    %c0_79 = arith.constant 0 : index
    %c0_80 = arith.constant 0 : index
    %90 = vector.load %arg11[%c0_77, %c0_78, %c0_79, %c0_80] : memref<1x8x16x4xf32, #tpu.memory_space<vmem>>, vector<1x8x16x4xf32>
    %91 = arith.addf %90, %89 : vector<1x8x16x4xf32>
    %c0_81 = arith.constant 0 : index
    %c0_82 = arith.constant 0 : index
    %c0_83 = arith.constant 0 : index
    %c0_84 = arith.constant 0 : index
    %92 = vector.load %arg11[%c0_81, %c0_82, %c0_83, %c0_84] : memref<1x8x16x4xf32, #tpu.memory_space<vmem>>, vector<1x8x16x4xf32>
    tpu.vector_store %arg11[%c0_81, %c0_82, %c0_83, %c0_84], %91 {strides = array<i32>} : memref<1x8x16x4xf32, #tpu.memory_space<vmem>>, vector<1x8x16x4xf32>,
    %c1_85 = arith.constant 1 : index
    %c0_86 = arith.constant 0 : index
    %c0_87 = arith.constant 0 : index
    %93 = vector.load %arg12[%c1_85, %c0_86, %c0_87] : memref<10x18x2xf32, #tpu.memory_space<vmem>>, vector<8x16x2xf32>
    %94 = vector.shape_cast %93 : vector<8x16x2xf32> to vector<128x2xf32>
    %95 = arith.truncf %94 : vector<128x2xf32> to vector<128x2xbf16>
    %c1_88 = arith.constant 1 : index
    %c0_89 = arith.constant 0 : index
    %c0_90 = arith.constant 0 : index
    %c0_91 = arith.constant 0 : index
    %96 = vector.load %arg8[%c1_88, %c0_89, %c0_90, %c0_91] : memref<3x3x2x4xbf16, #tpu.memory_space<vmem>>, vector<1x1x2x4xbf16>
    %97 = vector.shape_cast %96 : vector<1x1x2x4xbf16> to vector<2x4xbf16>
    %cst_92 = arith.constant dense<0.000000e+00> : vector<128x4xf32>
    %98 = tpu.matmul %95, %97, %cst_92 {dimension_numbers = #tpu.dot_dimension_numbers<[1], [0], [0], [1], [0, 0, 1, 1], [], []>} : vector<128x2xbf16>, vector<2x4xbf16>, vector<128x4xf32> -> vector<128x4xf32>
    %99 = vector.shape_cast %98 : vector<128x4xf32> to vector<1x8x16x4xf32>
    %c0_93 = arith.constant 0 : index
    %c0_94 = arith.constant 0 : index
    %c0_95 = arith.constant 0 : index
    %c0_96 = arith.constant 0 : index
    %100 = vector.load %arg11[%c0_93, %c0_94, %c0_95, %c0_96] : memref<1x8x16x4xf32, #tpu.memory_space<vmem>>, vector<1x8x16x4xf32>
    %101 = arith.addf %100, %99 : vector<1x8x16x4xf32>
    %c0_97 = arith.constant 0 : index
    %c0_98 = arith.constant 0 : index
    %c0_99 = arith.constant 0 : index
    %c0_100 = arith.constant 0 : index
    %102 = vector.load %arg11[%c0_97, %c0_98, %c0_99, %c0_100] : memref<1x8x16x4xf32, #tpu.memory_space<vmem>>, vector<1x8x16x4xf32>
    tpu.vector_store %arg11[%c0_97, %c0_98, %c0_99, %c0_100], %101 {strides = array<i32>} : memref<1x8x16x4xf32, #tpu.memory_space<vmem>>, vector<1x8x16x4xf32>,
    %c1_101 = arith.constant 1 : index
    %c1_102 = arith.constant 1 : index
    %c0_103 = arith.constant 0 : index
    %103 = vector.load %arg12[%c1_101, %c1_102, %c0_103] : memref<10x18x2xf32, #tpu.memory_space<vmem>>, vector<8x16x2xf32>
    %104 = vector.shape_cast %103 : vector<8x16x2xf32> to vector<128x2xf32>
    %105 = arith.truncf %104 : vector<128x2xf32> to vector<128x2xbf16>
    %c1_104 = arith.constant 1 : index
    %c1_105 = arith.constant 1 : index
    %c0_106 = arith.constant 0 : index
    %c0_107 = arith.constant 0 : index
    %106 = vector.load %arg8[%c1_104, %c1_105, %c0_106, %c0_107] : memref<3x3x2x4xbf16, #tpu.memory_space<vmem>>, vector<1x1x2x4xbf16>
    %107 = vector.shape_cast %106 : vector<1x1x2x4xbf16> to vector<2x4xbf16>
    %cst_108 = arith.constant dense<0.000000e+00> : vector<128x4xf32>
    %108 = tpu.matmul %105, %107, %cst_108 {dimension_numbers = #tpu.dot_dimension_numbers<[1], [0], [0], [1], [0, 0, 1, 1], [], []>} : vector<128x2xbf16>, vector<2x4xbf16>, vector<128x4xf32> -> vector<128x4xf32>
    %109 = vector.shape_cast %108 : vector<128x4xf32> to vector<1x8x16x4xf32>
    %c0_109 = arith.constant 0 : index
    %c0_110 = arith.constant 0 : index
    %c0_111 = arith.constant 0 : index
    %c0_112 = arith.constant 0 : index
    %110 = vector.load %arg11[%c0_109, %c0_110, %c0_111, %c0_112] : memref<1x8x16x4xf32, #tpu.memory_space<vmem>>, vector<1x8x16x4xf32>
    %111 = arith.addf %110, %109 : vector<1x8x16x4xf32>
    %c0_113 = arith.constant 0 : index
    %c0_114 = arith.constant 0 : index
    %c0_115 = arith.constant 0 : index
    %c0_116 = arith.constant 0 : index
    %112 = vector.load %arg11[%c0_113, %c0_114, %c0_115, %c0_116] : memref<1x8x16x4xf32, #tpu.memory_space<vmem>>, vector<1x8x16x4xf32>
    tpu.vector_store %arg11[%c0_113, %c0_114, %c0_115, %c0_116], %111 {strides = array<i32>} : memref<1x8x16x4xf32, #tpu.memory_space<vmem>>, vector<1x8x16x4xf32>,
    %c1_117 = arith.constant 1 : index
    %c2_118 = arith.constant 2 : index
    %c0_119 = arith.constant 0 : index
    %113 = vector.load %arg12[%c1_117, %c2_118, %c0_119] : memref<10x18x2xf32, #tpu.memory_space<vmem>>, vector<8x16x2xf32>
    %114 = vector.shape_cast %113 : vector<8x16x2xf32> to vector<128x2xf32>
    %115 = arith.truncf %114 : vector<128x2xf32> to vector<128x2xbf16>
    %c1_120 = arith.constant 1 : index
    %c2_121 = arith.constant 2 : index
    %c0_122 = arith.constant 0 : index
    %c0_123 = arith.constant 0 : index
    %116 = vector.load %arg8[%c1_120, %c2_121, %c0_122, %c0_123] : memref<3x3x2x4xbf16, #tpu.memory_space<vmem>>, vector<1x1x2x4xbf16>
    %117 = vector.shape_cast %116 : vector<1x1x2x4xbf16> to vector<2x4xbf16>
    %cst_124 = arith.constant dense<0.000000e+00> : vector<128x4xf32>
    %118 = tpu.matmul %115, %117, %cst_124 {dimension_numbers = #tpu.dot_dimension_numbers<[1], [0], [0], [1], [0, 0, 1, 1], [], []>} : vector<128x2xbf16>, vector<2x4xbf16>, vector<128x4xf32> -> vector<128x4xf32>
    %119 = vector.shape_cast %118 : vector<128x4xf32> to vector<1x8x16x4xf32>
    %c0_125 = arith.constant 0 : index
    %c0_126 = arith.constant 0 : index
    %c0_127 = arith.constant 0 : index
    %c0_128 = arith.constant 0 : index
    %120 = vector.load %arg11[%c0_125, %c0_126, %c0_127, %c0_128] : memref<1x8x16x4xf32, #tpu.memory_space<vmem>>, vector<1x8x16x4xf32>
    %121 = arith.addf %120, %119 : vector<1x8x16x4xf32>
    %c0_129 = arith.constant 0 : index
    %c0_130 = arith.constant 0 : index
    %c0_131 = arith.constant 0 : index
    %c0_132 = arith.constant 0 : index
    %122 = vector.load %arg11[%c0_129, %c0_130, %c0_131, %c0_132] : memref<1x8x16x4xf32, #tpu.memory_space<vmem>>, vector<1x8x16x4xf32>
    tpu.vector_store %arg11[%c0_129, %c0_130, %c0_131, %c0_132], %121 {strides = array<i32>} : memref<1x8x16x4xf32, #tpu.memory_space<vmem>>, vector<1x8x16x4xf32>,
    %c2_133 = arith.constant 2 : index
    %c0_134 = arith.constant 0 : index
    %c0_135 = arith.constant 0 : index
    %123 = vector.load %arg12[%c2_133, %c0_134, %c0_135] : memref<10x18x2xf32, #tpu.memory_space<vmem>>, vector<8x16x2xf32>
    %124 = vector.shape_cast %123 : vector<8x16x2xf32> to vector<128x2xf32>
    %125 = arith.truncf %124 : vector<128x2xf32> to vector<128x2xbf16>
    %c2_136 = arith.constant 2 : index
    %c0_137 = arith.constant 0 : index
    %c0_138 = arith.constant 0 : index
    %c0_139 = arith.constant 0 : index
    %126 = vector.load %arg8[%c2_136, %c0_137, %c0_138, %c0_139] : memref<3x3x2x4xbf16, #tpu.memory_space<vmem>>, vector<1x1x2x4xbf16>
    %127 = vector.shape_cast %126 : vector<1x1x2x4xbf16> to vector<2x4xbf16>
    %cst_140 = arith.constant dense<0.000000e+00> : vector<128x4xf32>
    %128 = tpu.matmul %125, %127, %cst_140 {dimension_numbers = #tpu.dot_dimension_numbers<[1], [0], [0], [1], [0, 0, 1, 1], [], []>} : vector<128x2xbf16>, vector<2x4xbf16>, vector<128x4xf32> -> vector<128x4xf32>
    %129 = vector.shape_cast %128 : vector<128x4xf32> to vector<1x8x16x4xf32>
    %c0_141 = arith.constant 0 : index
    %c0_142 = arith.constant 0 : index
    %c0_143 = arith.constant 0 : index
    %c0_144 = arith.constant 0 : index
    %130 = vector.load %arg11[%c0_141, %c0_142, %c0_143, %c0_144] : memref<1x8x16x4xf32, #tpu.memory_space<vmem>>, vector<1x8x16x4xf32>
    %131 = arith.addf %130, %129 : vector<1x8x16x4xf32>
    %c0_145 = arith.constant 0 : index
    %c0_146 = arith.constant 0 : index
    %c0_147 = arith.constant 0 : index
    %c0_148 = arith.constant 0 : index
    %132 = vector.load %arg11[%c0_145, %c0_146, %c0_147, %c0_148] : memref<1x8x16x4xf32, #tpu.memory_space<vmem>>, vector<1x8x16x4xf32>
    tpu.vector_store %arg11[%c0_145, %c0_146, %c0_147, %c0_148], %131 {strides = array<i32>} : memref<1x8x16x4xf32, #tpu.memory_space<vmem>>, vector<1x8x16x4xf32>,
    %c2_149 = arith.constant 2 : index
    %c1_150 = arith.constant 1 : index
    %c0_151 = arith.constant 0 : index
    %133 = vector.load %arg12[%c2_149, %c1_150, %c0_151] : memref<10x18x2xf32, #tpu.memory_space<vmem>>, vector<8x16x2xf32>
    %134 = vector.shape_cast %133 : vector<8x16x2xf32> to vector<128x2xf32>
    %135 = arith.truncf %134 : vector<128x2xf32> to vector<128x2xbf16>
    %c2_152 = arith.constant 2 : index
    %c1_153 = arith.constant 1 : index
    %c0_154 = arith.constant 0 : index
    %c0_155 = arith.constant 0 : index
    %136 = vector.load %arg8[%c2_152, %c1_153, %c0_154, %c0_155] : memref<3x3x2x4xbf16, #tpu.memory_space<vmem>>, vector<1x1x2x4xbf16>
    %137 = vector.shape_cast %136 : vector<1x1x2x4xbf16> to vector<2x4xbf16>
    %cst_156 = arith.constant dense<0.000000e+00> : vector<128x4xf32>
    %138 = tpu.matmul %135, %137, %cst_156 {dimension_numbers = #tpu.dot_dimension_numbers<[1], [0], [0], [1], [0, 0, 1, 1], [], []>} : vector<128x2xbf16>, vector<2x4xbf16>, vector<128x4xf32> -> vector<128x4xf32>
    %139 = vector.shape_cast %138 : vector<128x4xf32> to vector<1x8x16x4xf32>
    %c0_157 = arith.constant 0 : index
    %c0_158 = arith.constant 0 : index
    %c0_159 = arith.constant 0 : index
    %c0_160 = arith.constant 0 : index
    %140 = vector.load %arg11[%c0_157, %c0_158, %c0_159, %c0_160] : memref<1x8x16x4xf32, #tpu.memory_space<vmem>>, vector<1x8x16x4xf32>
    %141 = arith.addf %140, %139 : vector<1x8x16x4xf32>
    %c0_161 = arith.constant 0 : index
    %c0_162 = arith.constant 0 : index
    %c0_163 = arith.constant 0 : index
    %c0_164 = arith.constant 0 : index
    %142 = vector.load %arg11[%c0_161, %c0_162, %c0_163, %c0_164] : memref<1x8x16x4xf32, #tpu.memory_space<vmem>>, vector<1x8x16x4xf32>
    tpu.vector_store %arg11[%c0_161, %c0_162, %c0_163, %c0_164], %141 {strides = array<i32>} : memref<1x8x16x4xf32, #tpu.memory_space<vmem>>, vector<1x8x16x4xf32>,
    %c2_165 = arith.constant 2 : index
    %c2_166 = arith.constant 2 : index
    %c0_167 = arith.constant 0 : index
    %143 = vector.load %arg12[%c2_165, %c2_166, %c0_167] : memref<10x18x2xf32, #tpu.memory_space<vmem>>, vector<8x16x2xf32>
    %144 = vector.shape_cast %143 : vector<8x16x2xf32> to vector<128x2xf32>
    %145 = arith.truncf %144 : vector<128x2xf32> to vector<128x2xbf16>
    %c2_168 = arith.constant 2 : index
    %c2_169 = arith.constant 2 : index
    %c0_170 = arith.constant 0 : index
    %c0_171 = arith.constant 0 : index
    %146 = vector.load %arg8[%c2_168, %c2_169, %c0_170, %c0_171] : memref<3x3x2x4xbf16, #tpu.memory_space<vmem>>, vector<1x1x2x4xbf16>
    %147 = vector.shape_cast %146 : vector<1x1x2x4xbf16> to vector<2x4xbf16>
    %cst_172 = arith.constant dense<0.000000e+00> : vector<128x4xf32>
    %148 = tpu.matmul %145, %147, %cst_172 {dimension_numbers = #tpu.dot_dimension_numbers<[1], [0], [0], [1], [0, 0, 1, 1], [], []>} : vector<128x2xbf16>, vector<2x4xbf16>, vector<128x4xf32> -> vector<128x4xf32>
    %149 = vector.shape_cast %148 : vector<128x4xf32> to vector<1x8x16x4xf32>
    %c0_173 = arith.constant 0 : index
    %c0_174 = arith.constant 0 : index
    %c0_175 = arith.constant 0 : index
    %c0_176 = arith.constant 0 : index
    %150 = vector.load %arg11[%c0_173, %c0_174, %c0_175, %c0_176] : memref<1x8x16x4xf32, #tpu.memory_space<vmem>>, vector<1x8x16x4xf32>
    %151 = arith.addf %150, %149 : vector<1x8x16x4xf32>
    %c0_177 = arith.constant 0 : index
    %c0_178 = arith.constant 0 : index
    %c0_179 = arith.constant 0 : index
    %c0_180 = arith.constant 0 : index
    %152 = vector.load %arg11[%c0_177, %c0_178, %c0_179, %c0_180] : memref<1x8x16x4xf32, #tpu.memory_space<vmem>>, vector<1x8x16x4xf32>
    tpu.vector_store %arg11[%c0_177, %c0_178, %c0_179, %c0_180], %151 {strides = array<i32>} : memref<1x8x16x4xf32, #tpu.memory_space<vmem>>, vector<1x8x16x4xf32>,
    %c0_181 = arith.constant 0 : index
    %c0_182 = arith.constant 0 : index
    %c0_183 = arith.constant 0 : index
    %c0_184 = arith.constant 0 : index
    %153 = vector.load %arg11[%c0_181, %c0_182, %c0_183, %c0_184] : memref<1x8x16x4xf32, #tpu.memory_space<vmem>>, vector<1x8x16x4xf32>
    %c0_185 = arith.constant 0 : index
    %c0_186 = arith.constant 0 : index
    %154 = vector.load %arg9[%c0_185, %c0_186] : memref<1x4xf32, #tpu.memory_space<vmem>>, vector<1x4xf32>
    %155 = vector.shape_cast %154 : vector<1x4xf32> to vector<1x1x1x4xf32>
    %156 = vector.broadcast %155 : vector<1x1x1x4xf32> to vector<1x8x16x4xf32>
    %157 = arith.mulf %153, %156 : vector<1x8x16x4xf32>
    %c0_187 = arith.constant 0 : index
    %c0_188 = arith.constant 0 : index
    %158 = vector.load %arg10[%c0_187, %c0_188] : memref<1x4xf32, #tpu.memory_space<vmem>>, vector<1x4xf32>
    %159 = vector.shape_cast %158 : vector<1x4xf32> to vector<1x1x1x4xf32>
    %160 = vector.broadcast %159 : vector<1x1x1x4xf32> to vector<1x8x16x4xf32>
    %161 = arith.addf %157, %160 : vector<1x8x16x4xf32>
    %cst_189 = arith.constant 0.000000e+00 : f32
    %162 = vector.broadcast %cst_189 : f32 to vector<1x8x16x4xf32>
    %163 = arith.subf %162, %161 : vector<1x8x16x4xf32>
    %164 = math.exp %163 : vector<1x8x16x4xf32>
    %cst_190 = arith.constant 1.000000e+00 : f32
    %165 = vector.broadcast %cst_190 : f32 to vector<1x8x16x4xf32>
    %166 = arith.addf %165, %164 : vector<1x8x16x4xf32>
    %167 = tpu.reciprocal %166 {approx = true} : vector<1x8x16x4xf32> -> vector<1x8x16x4xf32>
    %168 = arith.mulf %161, %167 : vector<1x8x16x4xf32>
    %c0_191 = arith.constant 0 : index
    %c0_192 = arith.constant 0 : index
    %c0_193 = arith.constant 0 : index
    %c0_194 = arith.constant 0 : index
    %169 = vector.load %arg2[%c0_191, %c0_192, %c0_193, %c0_194] : memref<1x8x16x4xf32, #tpu.memory_space<vmem>>, vector<1x8x16x4xf32>
    %170 = arith.addf %168, %169 : vector<1x8x16x4xf32>
    %c0_195 = arith.constant 0 : index
    %c0_196 = arith.constant 0 : index
    %c0_197 = arith.constant 0 : index
    %c0_198 = arith.constant 0 : index
    %171 = vector.load %arg11[%c0_195, %c0_196, %c0_197, %c0_198] : memref<1x8x16x4xf32, #tpu.memory_space<vmem>>, vector<1x8x16x4xf32>
    tpu.vector_store %arg11[%c0_195, %c0_196, %c0_197, %c0_198], %170 {strides = array<i32>} : memref<1x8x16x4xf32, #tpu.memory_space<vmem>>, vector<1x8x16x4xf32>,
    return
  }
  func.func @transform_0(%arg0: i32, %arg1: i32) -> (i32, i32, i32, i32) {
    %c0_i32 = arith.constant 0 : i32
    %c0_i32_0 = arith.constant 0 : i32
    %c0_i32_1 = arith.constant 0 : i32
    return %arg0, %arg1, %c0_i32, %c0_i32_0 : i32, i32, i32, i32
  }
  func.func @transform_1(%arg0: i32, %arg1: i32) -> (i32, i32, i32, i32) {
    %c8_i32 = arith.constant 8 : i32
    %0 = arith.muli %arg1, %c8_i32 : i32
    %c1_i32 = arith.constant 1 : i32
    %1 = arith.subi %0, %c1_i32 : i32
    %c0_i32 = arith.constant 0 : i32
    %2 = arith.maxsi %1, %c0_i32 : i32
    %c0_i32_0 = arith.constant 0 : i32
    %c0_i32_1 = arith.constant 0 : i32
    %c0_i32_2 = arith.constant 0 : i32
    return %arg0, %2, %c0_i32_0, %c0_i32_1 : i32, i32, i32, i32
  }
  func.func @transform_2(%arg0: i32, %arg1: i32) -> (i32, i32, i32, i32) {
    %c1_i32 = arith.constant 1 : i32
    %0 = arith.addi %arg1, %c1_i32 : i32
    %c8_i32 = arith.constant 8 : i32
    %1 = arith.muli %0, %c8_i32 : i32
    %c15_i32 = arith.constant 15 : i32
    %2 = arith.minsi %1, %c15_i32 : i32
    %c0_i32 = arith.constant 0 : i32
    %c0_i32_0 = arith.constant 0 : i32
    %c0_i32_1 = arith.constant 0 : i32
    return %arg0, %2, %c0_i32, %c0_i32_0 : i32, i32, i32, i32
  }
  func.func @transform_3(%arg0: i32, %arg1: i32) -> (i32, i32) {
    %c0_i32 = arith.constant 0 : i32
    %c0_i32_0 = arith.constant 0 : i32
    %c0_i32_1 = arith.constant 0 : i32
    return %c0_i32, %c0_i32_0 : i32, i32
  }
  func.func @transform_4(%arg0: i32, %arg1: i32) -> (i32, i32) {
    %c0_i32 = arith.constant 0 : i32
    %c0_i32_0 = arith.constant 0 : i32
    %c0_i32_1 = arith.constant 0 : i32
    return %c0_i32, %c0_i32_0 : i32, i32
  }
  func.func @transform_5(%arg0: i32, %arg1: i32) -> (i32, i32) {
    %c0_i32 = arith.constant 0 : i32
    %c0_i32_0 = arith.constant 0 : i32
    %c0_i32_1 = arith.constant 0 : i32
    return %c0_i32, %c0_i32_0 : i32, i32
  }
  func.func @transform_6(%arg0: i32, %arg1: i32) -> (i32, i32, i32, i32) {
    %c0_i32 = arith.constant 0 : i32
    %c0_i32_0 = arith.constant 0 : i32
    %c0_i32_1 = arith.constant 0 : i32
    %c0_i32_2 = arith.constant 0 : i32
    %c0_i32_3 = arith.constant 0 : i32
    return %c0_i32, %c0_i32_0, %c0_i32_1, %c0_i32_2 : i32, i32, i32, i32
  }
  func.func @transform_7(%arg0: i32, %arg1: i32) -> (i32, i32) {
    %c0_i32 = arith.constant 0 : i32
    %c0_i32_0 = arith.constant 0 : i32
    %c0_i32_1 = arith.constant 0 : i32
    return %c0_i32, %c0_i32_0 : i32, i32
  }
  func.func @transform_8(%arg0: i32, %arg1: i32) -> (i32, i32) {
    %c0_i32 = arith.constant 0 : i32
    %c0_i32_0 = arith.constant 0 : i32
    %c0_i32_1 = arith.constant 0 : i32
    return %c0_i32, %c0_i32_0 : i32, i32
  }
  func.func @transform_9(%arg0: i32, %arg1: i32) -> (i32, i32, i32, i32) {
    %c0_i32 = arith.constant 0 : i32
    %c0_i32_0 = arith.constant 0 : i32
    %c0_i32_1 = arith.constant 0 : i32
    return %arg0, %arg1, %c0_i32, %c0_i32_0 : i32, i32, i32, i32
  }
}

</mosaic_0001>

<bundles_post_ra>
// kernel: tpu_custom_call.1
= control target key start
LH: loop header
LB: loop body
LE: loop exit
PB: predicated region body
PF: predicated region fallthrough
CT: control target
= control target key end

     0   :  { %s3787_s30 = smov 0   ;;  %s3789_s10 = smov 0   ;;  %s4913_s0 = inlined_call_operand.vmem [shape: f32[2,16,16,4], index: 0, kind: input, shape index: {}]   ;;  %s4914_s1 = inlined_call_operand.vmem [shape: f32[2,16,16,4], index: 1, kind: input, shape index: {}]   ;;  %s4915_s2 = inlined_call_operand.vmem [shape: f32[2,16,16,4], index: 2, kind: input, shape index: {}]   ;;  %s4916_s3 = inlined_call_operand.vmem [shape: bf16[4,2], index: 3, kind: input, shape index: {}]   ;;  %s4917_s4 = inlined_call_operand.vmem [shape: f32[1,2], index: 4, kind: input, shape index: {}]   ;;  %s4918_s5 = inlined_call_operand.vmem [shape: f32[1,2], index: 5, kind: input, shape index: {}]   ;;  %s4919_s6 = inlined_call_operand.vmem [shape: bf16[3,3,2,4], index: 6, kind: input, shape index: {}]   ;;  %s4920_s7 = inlined_call_operand.vmem [shape: f32[1,4], index: 7, kind: input, shape index: {}]   ;;  %s4921_s8 = inlined_call_operand.vmem [shape: f32[1,4], index: 8, kind: input, shape index: {}]   ;;  %s4922_s9 = inlined_call_operand.vmem [shape: f32[2,16,16,4], index: 9, kind: output, shape index: {}]  }
   0x1   :  { %s3791_s11 = smov 0   ;;  %s3793_s12 = smov 0  }
   0x2   :  { %s3795_s13 = smov 0  }
   0x3 LB: > { %s28_s14 = sadd.s32 1, %s3725_s11  ;;  %s31_s15 = sadd.s32 1, %s3729_s12  ;;  %s3733_s13 = sphi %s3795_s13, %s19_s13   ;;  %s3729_s12 = sphi %s3793_s12, %s4927_s12   ;;  %s3725_s11 = sphi %s3791_s11, %s4926_s11   ;;  %s3721_s10 = sphi %s3789_s10, %s4925_s10   ;;  %s3717_s30 = sphi %s3787_s30, %s4924_s30  }
   0x4   : > { %p29_p0 = scmp.ge.s32.totalorder %s28_s14, 2  ;;  %p3083_p1 = scmp.ge.s32.totalorder %s3733_s13, 1 }
   0x5   : > { %p373_p2 = scmp.lt.s32.totalorder %s3733_s13, 5 }
   0x6   : > { %s4929_s14 = smov (%p29_p0, %s28_s14), 0  ;;  %s4931_s15 = smov (!%p29_p0, %s31_s15), %s3729_s12 }
   0x7   : > { %p374_p3 = pnand %p3083_p1, %p373_p2  ;;  %p33_p4 = scmp.ge.s32.totalorder %s4931_s15, 2 }
   0x8   : > { %s3823_s18 = sshll.u32 (!%p374_p3), %s3717_s30, 3  ;;  %p446_p5 = scmp.lt.s32.totalorder (!%p374_p3), %s3721_s10, 1 }
   0x9   : > { %s4933_s15 = smov (%p33_p4, %s4931_s15), 0  ;;  %377 = sbr.rel (%p374_p3) target bundleno = 713 (0x2c9), region = 56 }
   0xa   : > { %p448_p6 = scmp.lt.s32.totalorder (!%p374_p3), %s3823_s18, 15  ;;  %s3212_s23 = sadd.s32 (!%p374_p3), 8, %s3823_s18 }
   0xb   : > { %p3838_p7 = scmp.lt.s32.totalorder (!%p374_p3), %s3212_s23, 15  ;;  %s3089_s29 = sadd.s32 (!%p374_p3), 4294967295, %s3823_s18 }
   0xc   : > { %p458_p8 = scmp.gt.s32.totalorder (!%p374_p3), %s3089_s29, 0  ;;  %p3090_p9 = scmp.lt.s32.totalorder (!%p374_p3), %s3089_s29, 15 }
   0xd   : > { %p797_p10 = scmp.lt.s32.totalorder (!%p374_p3), %s3717_s30, 1  ;;  %p795_p11 = scmp.gt.s32.totalorder (!%p374_p3), %s3717_s30, 0 }
   0xe   : > { %v502_v0 = vld [vmem:[%s4916_s3] sm:$0x3]  ;;  %vm554_vm0 = vcmask 1041408   ;;  %s4935_s10 = smov (!%p446_p5, %s3721_s10), 1  ;;  %v3735_v2 = vmov 0.0   ;;  %vm3736_vm1 = vmmov 0  }
   0xf   : > { %v556_v1 = vsel %vm554_vm0, %v502_v0, 0  ;;  %3499 = vmatprep.subr.msk.bf16.mxu0 %vm554_vm0, %v502_v0  ;;  %3331 = vmatprep.subr.bf16.mxu1 %v3735_v2  ;;  %s449_s19 = scalar_select %p448_p6, %s3823_s18, 15  ;;  %vm529_vm2 = vcmask 31744   ;;  %vm931_vm3 = vcmask 8192   ;;  %v999_v33 = vld [vmem:[%s4919_s6] sm:$0x1] }
  0x10   : > { %3308 = vmatpush3.bf16.msra.mxu0 %v556_v1  ;;  %3332 = vmatpush3.bf16.msra.mxu1 %v556_v1  ;;  %s3829_s20 = sshll.u32 %s4935_s10, 5  ;;  %s4937_s23 = smov (!%p3838_p7, %s3212_s23), 15  ;;  %932 = vst.msk [vmem:[#allocation2] sm:$0x1] %vm931_vm3, %v3735_v2  ;;  %933 = vst.msk [vmem:[#allocation2 + $0x18] sm:$0x1] %vm931_vm3, %v3735_v2 }
  0x11   : > { %3325 = vmatprep.subr.bf16.mxu0 %v3735_v2  ;;  %3333 = vmatprep.mubr.msk.bf16.mxu1 %vm3736_vm1, %v3735_v2  ;;  %s3085_s21 = sshll.u32 %s449_s19, 1  ;;  %s4939_s23 = smov (!%p3838_p7, %s4937_s23), 15  ;;  %934 = vst.msk [vmem:[#allocation2 + $0x30] sm:$0x1] %vm931_vm3, %v3735_v2  ;;  %935 = vst.msk [vmem:[#allocation2 + $0x48] sm:$0x1] %vm931_vm3, %v3735_v2 }
  0x12   : > { %s3834_s22 = sadd.s32 %s3829_s20, %s3085_s21  ;;  %s3102_s10 = sshll.u32 %s4939_s23, 1  ;;  %936 = vst.msk [vmem:[#allocation2 + $0x60] sm:$0x1] %vm931_vm3, %v3735_v2  ;;  %937 = vst.msk [vmem:[#allocation2 + $0x78] sm:$0x1] %vm931_vm3, %v3735_v2  ;;  %vm1024_vm4 = vcmask 1040384  }
  0x13   : > { %s3087_s24 = sshll.u32 %s3834_s22, 3  ;;  %s483_s16 = sadd.s32 %s3102_s10, %s3829_s20  ;;  %938 = vst.msk [vmem:[#allocation2 + $0x90] sm:$0x1] %vm931_vm3, %v3735_v2  ;;  %939 = vst.msk [vmem:[#allocation2 + $0xa8] sm:$0x1] %vm931_vm3, %v3735_v2  ;;  %3500 = vmatprep.subr.msk.bf16.mxu1 %vm1024_vm4, %v999_v33  ;;  %v1026_v35 = vsel %vm1024_vm4, %v999_v33, 0 }
  0x14   : > { %s3847_s28 = scalar_lea.vmem %s4913_s0, %s3087_s24  ;;  %s3104_s17 = sshll.u32 %s483_s16, 3  ;;  %940 = vst.msk [vmem:[#allocation2 + $0xc0] sm:$0x1] %vm931_vm3, %v3735_v2  ;;  %941 = vst.msk [vmem:[#allocation2 + $0xd8] sm:$0x1] %vm931_vm3, %v3735_v2  ;;  %vm952_vm5 = vcmask 15360  }
  0x15   : > { %v505_v3 = vld [vmem:[%s3847_s28] sm:$0xff]  ;;  %v506_v4 = vld [vmem:[%s3847_s28 + $0x8] sm:$0xff]  ;;  %v507_v5 = vld [vmem:[%s3847_s28 + $0x10] sm:$0xff]  ;;  %s485_s21 = scalar_lea.vmem %s4915_s2, %s3104_s17  ;;  %s4941_s29 = smov (!%p458_p8, %s3089_s29), 0  ;;  %942 = vst.msk [vmem:[#allocation2 + $0x11] sm:$0x1] %vm931_vm3, %v3735_v2 }
  0x16   : > { %v521_v6 = vpack.c.bf16 %v506_v4, %v505_v3  ;;  %v508_v7 = vld [vmem:[%s3847_s28 + $0x18] sm:$0xff]  ;;  %v509_v8 = vld [vmem:[%s3847_s28 + $0x20] sm:$0xff]  ;;  %v510_v9 = vld [vmem:[%s3847_s28 + $0x28] sm:$0xff]  ;;  %s4943_s29 = smov (!%p3090_p9, %s4941_s29), 15  ;;  %943 = vst.msk [vmem:[#allocation2 + $0x29] sm:$0x1] %vm931_vm3, %v3735_v2 }
  0x17   : > { %v522_v10 = vpack.c.bf16 %v508_v7, %v507_v5  ;;  %v523_v11 = vpack.c.bf16 %v510_v9, %v509_v8  ;;  %v511_v12 = vld [vmem:[%s3847_s28 + $0x30] sm:$0xff]  ;;  %v512_v13 = vld [vmem:[%s3847_s28 + $0x38] sm:$0xff]  ;;  %v513_v14 = vld [vmem:[%s3847_s28 + $0x40] sm:$0xff]  ;;  %s3095_s23 = sshll.u32 %s4943_s29, 1  ;;  %944 = vst.msk [vmem:[#allocation2 + $0x41] sm:$0x1] %vm931_vm3, %v3735_v2 }
  0x18   : > { %3309 = vmatprep.mubr.msk.bf16.mxu0 %vm529_vm2, %v521_v6  ;;  %v514_v15 = vld [vmem:[%s3847_s28 + $0x48] sm:$0xff]  ;;  %v524_v16 = vpack.c.bf16 %v512_v13, %v511_v12  ;;  %v865_v18 = vld [vmem:[%s485_s21] sm:$0xff]  ;;  %v515_v21 = vld [vmem:[%s3847_s28 + $0x50] sm:$0xff]  ;;  %s466_s25 = sadd.s32 %s3095_s23, %s3829_s20  ;;  %945 = vst.msk [vmem:[#allocation2 + $0x59] sm:$0x1] %vm931_vm3, %v3735_v2 }
  0x19   : > { %3310 = vmatmul.mubr.msk.bf16.vlgmr.msra.gmra.mxu0 %vm529_vm2, %v522_v10  ;;  %v525_v17 = vpack.c.bf16 %v514_v15, %v513_v14  ;;  %v866_v19 = vld [vmem:[%s485_s21 + $0x8] sm:$0xff]  ;;  %v516_v22 = vld [vmem:[%s3847_s28 + $0x58] sm:$0xff]  ;;  %v517_v23 = vld [vmem:[%s3847_s28 + $0x60] sm:$0xff]  ;;  %s3097_s26 = sshll.u32 %s466_s25, 3  ;;  %946 = vst.msk [vmem:[#allocation2 + $0x71] sm:$0x1] %vm931_vm3, %v3735_v2 }
  0x1a   : > { %3326 = vmatpush3.bf16.msra.mxu0 %v556_v1  ;;  %3313 = vmatprep.mubr.msk.bf16.mxu0 %vm529_vm2, %v523_v11  ;;  %v867_v20 = vpack.c.bf16 %v866_v19, %v865_v18  ;;  %v518_v24 = vld [vmem:[%s3847_s28 + $0x68] sm:$0xff]  ;;  %v526_v25 = vpack.c.bf16 %v516_v22, %v515_v21  ;;  %v519_v27 = vld [vmem:[%s3847_s28 + $0x70] sm:$0xff]  ;;  %v520_v28 = vld [vmem:[%s3847_s28 + $0x78] sm:$0xff]  ;;  %s468_s16 = scalar_lea.vmem %s4914_s1, %s3097_s26  ;;  %947 = vst.msk [vmem:[#allocation2 + $0x89] sm:$0x1] %vm931_vm3, %v3735_v2 }
  0x1b   : > { %v527_v26 = vpack.c.bf16 %v518_v24, %v517_v23  ;;  %v528_v29 = vpack.c.bf16 %v520_v28, %v519_v27  ;;  %v799_v30 = vld [vmem:[%s468_s16] sm:$0xff]  ;;  %v800_v31 = vld [vmem:[%s468_s16 + $0x8] sm:$0xff]  ;;  %948 = vst.msk [vmem:[#allocation2 + $0xa1] sm:$0x1] %vm931_vm3, %v3735_v2  ;;  %949 = vst.msk [vmem:[#allocation2 + $0xb9] sm:$0x1] %vm931_vm3, %v3735_v2 }
  0x1c   : > { %3334 = vmatmul.mubr.msk.bf16.vlgmr.msra.gmra.mxu1 %vm529_vm2, %v867_v20  ;;  %v801_v32 = vpack.c.bf16 %v800_v31, %v799_v30  ;;  %950 = vst.msk [vmem:[#allocation2 + $0xd1] sm:$0x1] %vm931_vm3, %v3735_v2  ;;  %951 = vst.msk [vmem:[#allocation2 + $0xe9] sm:$0x1] %vm931_vm3, %v3735_v2  ;;  %v3129_v34 = vld [vmem:[%s4919_s6 + $0x1] sm:$0x1] }
  0x1d   : > { %3501 = vmatprep.subr.msk.bf16.mxu0 %vm1024_vm4, %v3129_v34  ;;  %v1192_v36 = vsel %vm1024_vm4, %v3129_v34, 0  ;;  %3338 = vmatpush3.bf16.msra.mxu1 %v1026_v35  ;;  %v3943_v37 = vld [vmem:[%s4919_s6 + $0x2] sm:$0x1]  ;;  %v3950_v38 = vld [vmem:[%s4919_s6 + $0x3] sm:$0x1] }
  0x1e   : > { %3502 = vmatprep.subr.msk.bf16.mxu1 %vm1024_vm4, %v3943_v37  ;;  %v3957_v39 = vld [vmem:[%s4917_s4] ss:$0 sm:$0xff]  ;;  %s4078_s20 = scalar_select %p797_p10, 1.0, 0.0 }
  0x1f   : > { %v3962_v40 = vld [vmem:[%s4918_s5] ss:$0 sm:$0xff]  ;;  %s796_s29 = scalar_select %p795_p11, 1.0, 0.0 }
  0x21   : > { %3314 = vmatmul.mubr.msk.bf16.gmra.mxu0 %vm529_vm2, %v524_v16 }
  0x22   : > { %3317 = vmatprep.mubr.msk.bf16.mxu0 %vm529_vm2, %v525_v17 }
  0x29   : > { %3318 = vmatmul.mubr.msk.bf16.gmra.mxu0 %vm529_vm2, %v526_v25 }
  0x2a   : > { %3321 = vmatprep.mubr.msk.bf16.mxu0 %vm529_vm2, %v527_v26 }
  0x31   : > { %3322 = vmatmul.mubr.msk.bf16.gmra.mxu0 %vm529_vm2, %v528_v29 }
  0x32   : > { %3327 = vmatprep.mubr.msk.bf16.mxu0 %vm3736_vm1, %v3735_v2 }
  0x39   : > { %3328 = vmatmul.mubr.msk.bf16.vlgmr.msra.gmra.mxu0 %vm529_vm2, %v801_v32 }
  0x3a   : > { %3356 = vmatpush3.bf16.msra.mxu0 %v1192_v36 }
  0x3b   : > { %3503 = vmatprep.subr.msk.bf16.mxu0 %vm1024_vm4, %v3950_v38 }
  0xd9   : > { %v3311_v41 = vpop.f32.mrf.mxu0 }
  0xda   : > { %v663_v42 = vmul.f32 %v3311_v41, %v3957_v39 }
  0xdb   : > { %v592_v43 = vpop.f32.mrf.mxu0 }
  0xdc   : > { %v3966_v44 = vadd.f32 %v3962_v40, %v663_v42  ;;  %v661_v45 = vmul.f32 %v3957_v39, %v592_v43  ;;  %v905_v56 = vpop.f32.mrf.mxu1 }
  0xdd   : > { %v3312_v46 = vpop.f32.mrf.mxu0  ;;  %v912_v62 = vmul.f32 %v3957_v39, %v905_v56 }
  0xde   : > { %v701_v47 = vsub.f32 0.0, %v3966_v44  ;;  %v3971_v48 = vadd.f32 %v3962_v40, %v661_v45  ;;  %v664_v49 = vmul.f32 %v3312_v46, %v3957_v39  ;;  %v3335_v63 = vpop.f32.mrf.mxu1 }
  0xdf   : > { %v595_v50 = vpop.f32.mrf.mxu0  ;;  %v3991_v5 = vadd.f32 %v3962_v40, %v912_v62 }
  0xe0   : > { %v719_v51 = vmul.f32 1.442695, %v701_v47  ;;  %v699_v52 = vsub.f32 0.0, %v3971_v48  ;;  %v3976_v53 = vadd.f32 %v3962_v40, %v664_v49  ;;  %v662_v54 = vmul.f32 %v3957_v39, %v595_v50  ;;  %v908_v6 = vpop.f32.mrf.mxu1 }
  0xe1   : > { %v3315_v55 = vpop.f32.mrf.mxu0  ;;  %v916_v12 = vsub.f32 0.0, %v3991_v5  ;;  %v913_v13 = vmul.f32 %v3957_v39, %v908_v6 }
  0xe2   : > { %3551 = vpow2.f32 %v719_v51  ;;  %v715_v57 = vmul.f32 1.442695, %v699_v52  ;;  %v702_v58 = vsub.f32 0.0, %v3976_v53  ;;  %v3981_v59 = vadd.f32 %v3962_v40, %v662_v54  ;;  %v3336_v14 = vpop.f32.mrf.mxu1 }
  0xe3   : > { %v667_v60 = vmul.f32 %v3315_v55, %v3957_v39  ;;  %v608_v61 = vpop.f32.mrf.mxu0  ;;  %v918_v20 = vmul.f32 1.442695, %v916_v12  ;;  %v4006_v21 = vadd.f32 %v3962_v40, %v913_v13 }
  0xe4   : > { %3553 = vpow2.f32 %v715_v57  ;;  %v721_v0 = vmul.f32 1.442695, %v702_v58  ;;  %v700_v1 = vsub.f32 0.0, %v3981_v59  ;;  %v665_v2 = vmul.f32 %v3957_v39, %v608_v61 }
  0xe5   : > { %v3988_v3 = vadd.f32 %v3962_v40, %v667_v60  ;;  %v3316_v4 = vpop.f32.mrf.mxu0  ;;  %v917_v27 = vsub.f32 0.0, %v4006_v21 }
  0xe6   : > { %3555 = vpow2.f32 %v721_v0  ;;  %v717_v7 = vmul.f32 1.442695, %v700_v1  ;;  %v3994_v8 = vadd.f32 %v3962_v40, %v665_v2  ;;  %v668_v9 = vmul.f32 %v3316_v4, %v3957_v39 }
  0xe7   : > { %v705_v10 = vsub.f32 0.0, %v3988_v3  ;;  %v611_v11 = vpop.f32.mrf.mxu0  ;;  %v920_v33 = vmul.f32 1.442695, %v917_v27 }
  0xe8   : > { %3557 = vpow2.f32 %v717_v7  ;;  %v703_v15 = vsub.f32 0.0, %v3994_v8  ;;  %v4002_v16 = vadd.f32 %v3962_v40, %v668_v9  ;;  %v666_v17 = vmul.f32 %v3957_v39, %v611_v11 }
  0xe9   : > { %v727_v18 = vmul.f32 1.442695, %v705_v10  ;;  %v3319_v19 = vpop.f32.mrf.mxu0 }
  0xea   : > { %v723_v22 = vmul.f32 1.442695, %v703_v15  ;;  %v706_v23 = vsub.f32 0.0, %v4002_v16  ;;  %v4010_v24 = vadd.f32 %v3962_v40, %v666_v17  ;;  %v671_v25 = vmul.f32 %v3319_v19, %v3957_v39 }
  0xeb   : > { %3559 = vpow2.f32 %v727_v18  ;;  %v624_v26 = vpop.f32.mrf.mxu0 }
  0xec   : > { %3561 = vpow2.f32 %v723_v22  ;;  %v729_v28 = vmul.f32 1.442695, %v706_v23  ;;  %v704_v29 = vsub.f32 0.0, %v4010_v24  ;;  %v4016_v30 = vadd.f32 %v3962_v40, %v671_v25 }
  0xed   : > { %v669_v31 = vmul.f32 %v3957_v39, %v624_v26  ;;  %v3320_v32 = vpop.f32.mrf.mxu0  ;;  %3563 = vpow2.f32 %v918_v20 }
  0xee   : > { %3565 = vpow2.f32 %v729_v28  ;;  %v725_v34 = vmul.f32 1.442695, %v704_v29  ;;  %v709_v35 = vsub.f32 0.0, %v4016_v30  ;;  %v672_v36 = vmul.f32 %v3320_v32, %v3957_v39 }
  0xef   : > { %v3552_v41 = vpop.eup %3551  ;;  %v4022_v42 = vadd.f32 %v3962_v40, %v669_v31  ;;  %v627_v43 = vpop.f32.mrf.mxu0 }
  0xf0   : > { %v749_v45 = vadd.f32 1.0, %v3552_v41  ;;  %3567 = vpow2.f32 %v725_v34  ;;  %v735_v46 = vmul.f32 1.442695, %v709_v35  ;;  %v4025_v47 = vadd.f32 %v3962_v40, %v672_v36 }
  0xf1   : > { %v3554_v49 = vpop.eup %3553  ;;  %v707_v50 = vsub.f32 0.0, %v4022_v42  ;;  %v670_v51 = vmul.f32 %v3957_v39, %v627_v43  ;;  %v3323_v52 = vpop.f32.mrf.mxu0  ;;  %3569 = vpow2.f32 %v920_v33 }
  0xf2   : > { %3571 = vrcp.f32 %v749_v45  ;;  %v747_v54 = vadd.f32 1.0, %v3554_v49  ;;  %v710_v55 = vsub.f32 0.0, %v4025_v47  ;;  %v675_v56 = vmul.f32 %v3323_v52, %v3957_v39 }
  0xf3   : > { %v3556_v57 = vpop.eup %3555  ;;  %3573 = vpow2.f32 %v735_v46  ;;  %v731_v58 = vmul.f32 1.442695, %v707_v50  ;;  %v4032_v60 = vadd.f32 %v3962_v40, %v670_v51  ;;  %v640_v61 = vpop.f32.mrf.mxu0 }
  0xf4   : > { %3575 = vrcp.f32 %v747_v54  ;;  %v750_v62 = vadd.f32 1.0, %v3556_v57  ;;  %v737_v63 = vmul.f32 1.442695, %v710_v55  ;;  %v4035_v0 = vadd.f32 %v3962_v40, %v675_v56 }
  0xf5   : > { %v3558_v1 = vpop.eup %3557  ;;  %3577 = vpow2.f32 %v731_v58  ;;  %v708_v2 = vsub.f32 0.0, %v4032_v60  ;;  %v673_v4 = vmul.f32 %v3957_v39, %v640_v61  ;;  %v3324_v6 = vpop.f32.mrf.mxu0 }
  0xf6   : > { %3579 = vrcp.f32 %v750_v62  ;;  %v748_v7 = vadd.f32 1.0, %v3558_v1  ;;  %v713_v9 = vsub.f32 0.0, %v4035_v0  ;;  %v676_v10 = vmul.f32 %v3324_v6, %v3957_v39 }
  0xf7   : > { %3581 = vpow2.f32 %v737_v63  ;;  %v733_v11 = vmul.f32 1.442695, %v708_v2  ;;  %v4042_v12 = vadd.f32 %v3962_v40, %v673_v4  ;;  %v643_v13 = vpop.f32.mrf.mxu0 }
  0xf8   : > { %v3560_v14 = vpop.eup %3559  ;;  %3583 = vrcp.f32 %v748_v7  ;;  %v743_v15 = vmul.f32 1.442695, %v713_v9  ;;  %v4045_v17 = vadd.f32 %v3962_v40, %v676_v10  ;;  %v674_v18 = vmul.f32 %v3957_v39, %v643_v13 }
  0xf9   : > { %v3562_v19 = vpop.eup %3561  ;;  %v753_v20 = vadd.f32 1.0, %v3560_v14  ;;  %3585 = vpow2.f32 %v733_v11  ;;  %v711_v22 = vsub.f32 0.0, %v4042_v12  ;;  %v839_v23 = vpop.f32.mrf.mxu0 }
  0xfa   : > { %v3564_v25 = vpop.eup %3563  ;;  %v751_v26 = vadd.f32 1.0, %v3562_v19  ;;  %3587 = vpow2.f32 %v743_v15  ;;  %v714_v27 = vsub.f32 0.0, %v4045_v17  ;;  %v4051_v28 = vadd.f32 %v3962_v40, %v674_v18 }
  0xfb   : > { %v3566_v29 = vpop.eup %3565  ;;  %3589 = vrcp.f32 %v753_v20  ;;  %v739_v31 = vmul.f32 1.442695, %v711_v22  ;;  %v846_v32 = vmul.f32 %v3957_v39, %v839_v23  ;;  %v3329_v33 = vpop.f32.mrf.mxu0  ;;  %v922_v46 = vadd.f32 1.0, %v3564_v25 }
  0xfc   : > { %3591 = vrcp.f32 %v751_v26  ;;  %v754_v34 = vadd.f32 1.0, %v3566_v29  ;;  %v745_v35 = vmul.f32 1.442695, %v714_v27  ;;  %v712_v36 = vsub.f32 0.0, %v4051_v28 }
  0xfd   : > { %v3568_v41 = vpop.eup %3567  ;;  %3593 = vpow2.f32 %v739_v31  ;;  %v4056_v43 = vadd.f32 %v3962_v40, %v846_v32  ;;  %v842_v45 = vpop.f32.mrf.mxu0 }
  0xfe   : > { %v3570_v49 = vpop.eup %3569  ;;  %3595 = vrcp.f32 %v754_v34  ;;  %v752_v50 = vadd.f32 1.0, %v3568_v41  ;;  %v741_v51 = vmul.f32 1.442695, %v712_v36  ;;  %v847_v52 = vmul.f32 %v3957_v39, %v842_v45 }
  0xff   : > { %v3572_v54 = vpop.eup %3571  ;;  %3597 = vpow2.f32 %v745_v35  ;;  %v850_v55 = vsub.f32 0.0, %v4056_v43  ;;  %v3330_v56 = vpop.f32.mrf.mxu0  ;;  %v923_v10 = vadd.f32 1.0, %v3570_v49  ;;  %v928_v35 = vstv %s4078_s20 }
 0x100   : > { %v3574_v57 = vpop.eup %3573  ;;  %v781_v58 = vmul.f32 %v3572_v54, %v3966_v44  ;;  %3599 = vrcp.f32 %v752_v50  ;;  %v4062_v61 = vadd.f32 %v3962_v40, %v847_v52 }
 0x101   : > { %v3576_v62 = vpop.eup %3575  ;;  %v757_v63 = vadd.f32 1.0, %v3574_v57  ;;  %3601 = vpow2.f32 %v741_v51  ;;  %v852_v1 = vmul.f32 1.442695, %v850_v55 }
 0x102   : > { %v3578_v2 = vpop.eup %3577  ;;  %958 = vst.msk [vmem:[#allocation2 + $0x31] sm:$0xff] %vm952_vm5, %v781_v58  ;;  %v779_v39 = vmul.f32 %v3576_v62, %v3971_v48  ;;  %v851_v4 = vsub.f32 0.0, %v4062_v61  ;;  %3603 = vrcp.f32 %v922_v46 }
 0x103   : > { %v3580_v6 = vpop.eup %3579  ;;  %3605 = vrcp.f32 %v757_v63  ;;  %v755_v7 = vadd.f32 1.0, %v3578_v2 }
 0x104   : > { %v3582_v44 = vpop.eup %3581  ;;  %956 = vst.msk [vmem:[#allocation2 + $0x19] sm:$0xff] %vm952_vm5, %v779_v39  ;;  %v782_v40 = vmul.f32 %v3580_v6, %v3976_v53  ;;  %3607 = vpow2.f32 %v852_v1  ;;  %v854_v9 = vmul.f32 1.442695, %v851_v4  ;;  %v862_v39 = vstv %s796_s29  ;;  %s4310_s29 = scalar_lea.vmem %s4922_s9, %s3087_s24 }
 0x105   : > { %v3584_v11 = vpop.eup %3583  ;;  %3609 = vrcp.f32 %v755_v7  ;;  %v758_v13 = vadd.f32 1.0, %v3582_v44 }
 0x106   : > { %v3586_v14 = vpop.eup %3585  ;;  %959 = vst.msk [vmem:[#allocation2 + $0x39] sm:$0xff] %vm952_vm5, %v782_v40  ;;  %v780_v48 = vmul.f32 %v3584_v11, %v3981_v59  ;;  %3611 = vpow2.f32 %v854_v9 }
 0x107   : > { %v3588_v15 = vpop.eup %3587  ;;  %3613 = vrcp.f32 %v758_v13  ;;  %v756_v18 = vadd.f32 1.0, %v3586_v14 }
 0x108   : > { %v3590_v19 = vpop.eup %3589  ;;  %957 = vst.msk [vmem:[#allocation2 + $0x21] sm:$0xff] %vm952_vm5, %v780_v48  ;;  %v761_v53 = vadd.f32 1.0, %v3588_v15  ;;  %3615 = vrcp.f32 %v923_v10 }
 0x109   : > { %v3592_v20 = vpop.eup %3591  ;;  %v785_v22 = vmul.f32 %v3590_v19, %v3988_v3  ;;  %3617 = vrcp.f32 %v756_v18 }
 0x10a   : > { %v3594_v23 = vpop.eup %3593  ;;  %v783_v25 = vmul.f32 %v3592_v20, %v3994_v8  ;;  %3619 = vrcp.f32 %v761_v53  ;;  %v1390_v53 = vsel %vm1024_vm4, %v3943_v37, 0  ;;  %v979_v20 = vld [vmem:[#allocation2 + $0x30] sm:$0xff]  ;;  %v3156_v37 = vld [vmem:[%s4919_s6 + $0x4] sm:$0x1] }
 0x10b   : > { %v3596_v59 = vpop.eup %3595  ;;  %962 = vst.msk [vmem:[#allocation2 + $0x61] sm:$0xff] %vm952_vm5, %v785_v22  ;;  %v759_v26 = vadd.f32 1.0, %v3594_v23  ;;  %v977_v15 = vld [vmem:[#allocation2 + $0x18] sm:$0xff] }
 0x10c   : > { %v3598_v27 = vpop.eup %3597  ;;  %960 = vst.msk [vmem:[#allocation2 + $0x49] sm:$0xff] %vm952_vm5, %v783_v25  ;;  %v786_v29 = vmul.f32 %v3596_v59, %v4002_v16  ;;  %v1145_v23 = vld [vmem:[#allocation2 + $0x31] sm:$0xff]  ;;  %v1588_v25 = vsel %vm1024_vm4, %v3950_v38, 0 }
 0x10d   : > { %v3600_v31 = vpop.eup %3599  ;;  %3621 = vrcp.f32 %v759_v26  ;;  %v762_v3 = vadd.f32 1.0, %v3598_v27  ;;  %v1146_v18 = vld [vmem:[#allocation2 + $0x39] sm:$0xff]  ;;  %v3165_v26 = vld [vmem:[%s4919_s6 + $0x5] sm:$0x1] }
 0x10e   : > { %v3602_v32 = vpop.eup %3601  ;;  %963 = vst.msk [vmem:[#allocation2 + $0x69] sm:$0xff] %vm952_vm5, %v786_v29  ;;  %v784_v8 = vmul.f32 %v3600_v31, %v4010_v24  ;;  %v4127_v59 = vpack.c.bf16 %v1146_v18, %v1145_v23 }
 0x10f   : > { %v3604_v33 = vpop.eup %3603  ;;  %3623 = vrcp.f32 %v762_v3  ;;  %v760_v34 = vadd.f32 1.0, %v3602_v32  ;;  %v978_v9 = vld [vmem:[#allocation2 + $0x20] sm:$0xff] }
 0x110   : > { %v3606_v36 = vpop.eup %3605  ;;  %961 = vst.msk [vmem:[#allocation2 + $0x51] sm:$0xff] %vm952_vm5, %v784_v8  ;;  %v926_v41 = vmul.f32 %v3604_v33, %v3991_v5  ;;  %v1144_v10 = vld [vmem:[#allocation2 + $0x21] sm:$0xff]  ;;  %v4111_v19 = vpack.c.bf16 %v978_v9, %v977_v15 }
 0x111   : > { %v3608_v45 = vpop.eup %3607  ;;  %v789_v16 = vmul.f32 %v3606_v36, %v4016_v30  ;;  %3625 = vrcp.f32 %v760_v34 }
 0x112   : > { %v3610_v46 = vpop.eup %3609  ;;  %v856_v49 = vadd.f32 1.0, %v3608_v45  ;;  %v929_v50 = vmul.f32 %v928_v35, %v926_v41  ;;  %v983_v34 = vld [vmem:[#allocation2 + $0x60] sm:$0xff] }
 0x113   : > { %v3612_v51 = vpop.eup %3611  ;;  %966 = vst.msk [vmem:[#allocation2 + $0x91] sm:$0xff] %vm952_vm5, %v789_v16  ;;  %v787_v24 = vmul.f32 %v3610_v46, %v4022_v42  ;;  %v981_v3 = vld [vmem:[#allocation2 + $0x48] sm:$0xff] }
 0x114   : > { %v3614_v52 = vpop.eup %3613  ;;  %3627 = vrcp.f32 %v856_v49  ;;  %v857_v54 = vadd.f32 1.0, %v3612_v51  ;;  %973 = vst.msk [vmem:[#allocation2 + $0xd9] sm:$0xff] %vm952_vm5, %v929_v50  ;;  %v1147_v32 = vld [vmem:[#allocation2 + $0x49] sm:$0xff] }
 0x115   : > { %v3616_v55 = vpop.eup %3615  ;;  %964 = vst.msk [vmem:[#allocation2 + $0x79] sm:$0xff] %vm952_vm5, %v787_v24  ;;  %v790_v5 = vmul.f32 %v3614_v52, %v4025_v47  ;;  %v984_v29 = vld [vmem:[#allocation2 + $0x68] sm:$0xff] }
 0x116   : > { %v3618_v30 = vpop.eup %3617  ;;  %3629 = vrcp.f32 %v857_v54  ;;  %v927_v56 = vmul.f32 %v3616_v55, %v4006_v21  ;;  %v1150_v31 = vld [vmem:[#allocation2 + $0x69] sm:$0xff]  ;;  %v4145_v36 = vpack.c.bf16 %v984_v29, %v983_v34  ;;  %v3192_v29 = vld [vmem:[%s4919_s6 + $0x8] sm:$0x1] }
 0x117   : > { %v3620_v57 = vpop.eup %3619  ;;  %967 = vst.msk [vmem:[#allocation2 + $0x99] sm:$0xff] %vm952_vm5, %v790_v5  ;;  %v788_v42 = vmul.f32 %v3618_v30, %v4032_v60  ;;  %v982_v38 = vld [vmem:[#allocation2 + $0x50] sm:$0xff] }
 0x118   : > { %v793_v58 = vmul.f32 %v3620_v57, %v4035_v0  ;;  %v930_v62 = vmul.f32 %v928_v35, %v927_v56  ;;  %v1148_v27 = vld [vmem:[#allocation2 + $0x51] sm:$0xff]  ;;  %v4141_v8 = vpack.c.bf16 %v982_v38, %v981_v3  ;;  %v1149_v35 = vld [vmem:[#allocation2 + $0x61] sm:$0xff] }
 0x119   : > { %965 = vst.msk [vmem:[#allocation2 + $0x81] sm:$0xff] %vm952_vm5, %v788_v42  ;;  %v4143_v33 = vpack.c.bf16 %v1148_v27, %v1147_v32  ;;  %v4147_v41 = vpack.c.bf16 %v1150_v31, %v1149_v35  ;;  %v1346_v9 = vld [vmem:[#allocation2 + $0x52] sm:$0xff] }
 0x11a   : > { %v3622_v63 = vpop.eup %3621  ;;  %970 = vst.msk [vmem:[#allocation2 + $0xc1] sm:$0xff] %vm952_vm5, %v793_v58  ;;  %974 = vst.msk [vmem:[#allocation2 + $0xe1] sm:$0xff] %vm952_vm5, %v930_v62  ;;  %v987_v54 = vld [vmem:[#allocation2 + $0x90] sm:$0xff] }
 0x11b   : > { %v791_v47 = vmul.f32 %v3622_v63, %v4042_v12  ;;  %v1153_v55 = vld [vmem:[#allocation2 + $0x91] sm:$0xff] }
 0x11c   : > { %v3624_v1 = vpop.eup %3623  ;;  %v985_v50 = vld [vmem:[#allocation2 + $0x78] sm:$0xff] }
 0x11d   : > { %968 = vst.msk [vmem:[#allocation2 + $0xa9] sm:$0xff] %vm952_vm5, %v791_v47  ;;  %v794_v21 = vmul.f32 %v3624_v1, %v4045_v17  ;;  %v980_v17 = vld [vmem:[#allocation2 + $0x38] sm:$0xff] }
 0x11e   : > { %v3626_v60 = vpop.eup %3625  ;;  %v4119_v22 = vpack.c.bf16 %v980_v17, %v979_v20  ;;  %v988_v46 = vld [vmem:[#allocation2 + $0x98] sm:$0xff]  ;;  %v3183_v17 = vld [vmem:[%s4919_s6 + $0x7] sm:$0x1] }
 0x11f   : > { %971 = vst.msk [vmem:[#allocation2 + $0xc9] sm:$0xff] %vm952_vm5, %v794_v21  ;;  %v792_v0 = vmul.f32 %v3626_v60, %v4051_v28  ;;  %v1154_v49 = vld [vmem:[#allocation2 + $0x99] sm:$0xff]  ;;  %v4161_v5 = vpack.c.bf16 %v988_v46, %v987_v54  ;;  %v2381_v27 = vsel %vm1024_vm4, %v3183_v17, 0 }
 0x120   : > { %v986_v45 = vld [vmem:[#allocation2 + $0x80] sm:$0xff]  ;;  %v4163_v30 = vpack.c.bf16 %v1154_v49, %v1153_v55  ;;  %v1351_v15 = vld [vmem:[#allocation2 + $0x92] sm:$0xff] }
 0x121   : > { %v3628_v2 = vpop.eup %3627  ;;  %969 = vst.msk [vmem:[#allocation2 + $0xb1] sm:$0xff] %vm952_vm5, %v792_v0  ;;  %v1152_v16 = vld [vmem:[#allocation2 + $0x81] sm:$0xff]  ;;  %v1151_v51 = vld [vmem:[#allocation2 + $0x79] sm:$0xff]  ;;  %v4157_v24 = vpack.c.bf16 %v986_v45, %v985_v50  ;;  %v2579_v45 = vsel %vm1024_vm4, %v3192_v29, 0 }
 0x122   : > { %v860_v4 = vmul.f32 %v3628_v2, %v4056_v43  ;;  %v1143_v43 = vld [vmem:[#allocation2 + $0x19] sm:$0xff]  ;;  %v4159_v52 = vpack.c.bf16 %v1152_v16, %v1151_v51  ;;  %v1342_v0 = vld [vmem:[#allocation2 + $0x22] sm:$0xff] }
 0x123   : > { %v3630_v6 = vpop.eup %3629  ;;  %v1341_v60 = vld [vmem:[#allocation2 + $0x1a] sm:$0xff]  ;;  %v1343_v2 = vld [vmem:[#allocation2 + $0x32] sm:$0xff]  ;;  %v2543_v46 = vld [vmem:[#allocation2 + $0xe2] sm:$0xff] }
 0x124   : > { %v863_v7 = vmul.f32 %v862_v39, %v860_v4  ;;  %v861_v12 = vmul.f32 %v3630_v6, %v4062_v61  ;;  %v4113_v61 = vpack.c.bf16 %v1144_v10, %v1143_v43  ;;  %v989_v62 = vld [vmem:[#allocation2 + $0xa8] sm:$0xff]  ;;  %v1356_v4 = vpack.c.bf16 %v1342_v0, %v1341_v60  ;;  %v1352_v43 = vld [vmem:[#allocation2 + $0x9a] sm:$0xff] }
 0x125   : > { %v1155_v63 = vld [vmem:[#allocation2 + $0xa9] sm:$0xff]  ;;  %v1786_v6 = vsel %vm1024_vm4, %v3156_v37, 0  ;;  %v1749_v32 = vld [vmem:[#allocation2 + $0xc1] sm:$0xff] }
 0x126   : > { %953 = vst.msk [vmem:[#allocation2 + $0x1] sm:$0xff] %vm952_vm5, %v863_v7  ;;  %v864_v44 = vmul.f32 %v862_v39, %v861_v12  ;;  %v1344_v39 = vld [vmem:[#allocation2 + $0x3a] sm:$0xff]  ;;  %v1984_v12 = vsel %vm1024_vm4, %v3165_v26, 0  ;;  %v1347_v10 = vld [vmem:[#allocation2 + $0x62] sm:$0xff]  ;;  %v1948_v3 = vld [vmem:[#allocation2 + $0xca] sm:$0xff] }
 0x127   : > { %v4185_v7 = vpack.c.bf16 %v1344_v39, %v1343_v2  ;;  %v1552_v23 = vld [vmem:[#allocation2 + $0xc8] sm:$0xff]  ;;  %v2542_v16 = vld [vmem:[#allocation2 + $0xda] sm:$0xff] }
 0x128   : > { %954 = vst.msk [vmem:[#allocation2 + $0x9] sm:$0xff] %vm952_vm5, %v864_v44  ;;  %v990_v56 = vld [vmem:[#allocation2 + $0xb0] sm:$0xff]  ;;  %v3174_v44 = vld [vmem:[%s4919_s6 + $0x6] sm:$0x1]  ;;  %v2551_v49 = vpack.c.bf16 %v2543_v46, %v2542_v16 }
 0x129   : > { %v1156_v57 = vld [vmem:[#allocation2 + $0xb1] sm:$0xff]  ;;  %v4173_v47 = vpack.c.bf16 %v990_v56, %v989_v62  ;;  %v2183_v38 = vsel %vm1024_vm4, %v3174_v44, 0  ;;  %v1947_v31 = vld [vmem:[#allocation2 + $0xc2] sm:$0xff] }
 0x12a   : > { %v4175_v1 = vpack.c.bf16 %v1156_v57, %v1155_v63  ;;  %v1354_v20 = vld [vmem:[#allocation2 + $0xb2] sm:$0xff]  ;;  %v1956_v35 = vpack.c.bf16 %v1948_v3, %v1947_v31 }
 0x12d   : > { %v975_v40 = vld [vmem:[#allocation2] sm:$0xff] }
 0x12e   : > { %v1141_v11 = vld [vmem:[#allocation2 + $0x1] sm:$0xff] }
 0x12f   : > { %v976_v28 = vld [vmem:[#allocation2 + $0x8] sm:$0xff] }
 0x130   : > { %v1142_v13 = vld [vmem:[#allocation2 + $0x9] sm:$0xff]  ;;  %v991_v14 = vpack.c.bf16 %v976_v28, %v975_v40 }
 0x131   : > { %v1157_v48 = vpack.c.bf16 %v1142_v13, %v1141_v11  ;;  %v1339_v42 = vld [vmem:[#allocation2 + $0x2] sm:$0xff]  ;;  %v1340_v58 = vld [vmem:[#allocation2 + $0xa] sm:$0xff] }
 0x132   : > { %3339 = vmatprep.mubr.msk.bf16.mxu1 %vm952_vm5, %v991_v14  ;;  %v1355_v21 = vpack.c.bf16 %v1340_v58, %v1339_v42  ;;  %v1345_v40 = vld [vmem:[#allocation2 + $0x4a] sm:$0xff]  ;;  %v1349_v14 = vld [vmem:[#allocation2 + $0x7a] sm:$0xff] }
 0x133   : > { %3357 = vmatprep.mubr.msk.bf16.mxu0 %vm952_vm5, %v1157_v48  ;;  %3340 = vmatmul.mubr.msk.bf16.vlgmr.msra.gmra.mxu1 %vm952_vm5, %v4111_v19  ;;  %v1348_v28 = vld [vmem:[#allocation2 + $0x6a] sm:$0xff]  ;;  %v4203_v11 = vpack.c.bf16 %v1346_v9, %v1345_v40  ;;  %v1350_v48 = vld [vmem:[#allocation2 + $0x82] sm:$0xff] }
 0x134   : > { %3358 = vmatmul.mubr.msk.bf16.vlgmr.msra.gmra.mxu0 %vm952_vm5, %v4113_v61  ;;  %3374 = vmatpush3.bf16.msra.mxu1 %v1390_v53  ;;  %v4205_v13 = vpack.c.bf16 %v1348_v28, %v1347_v10  ;;  %v4215_v18 = vpack.c.bf16 %v1350_v48, %v1349_v14  ;;  %v1353_v53 = vld [vmem:[#allocation2 + $0xaa] sm:$0xff] }
 0x135   : > { %3343 = vmatprep.mubr.msk.bf16.mxu1 %vm952_vm5, %v4119_v22  ;;  %3361 = vmatprep.mubr.msk.bf16.mxu0 %vm952_vm5, %v4127_v59 }
 0x136   : > { %3392 = vmatpush3.bf16.msra.mxu0 %v1588_v25  ;;  %3504 = vmatprep.subr.msk.bf16.mxu1 %vm1024_vm4, %v3156_v37  ;;  %v1551_v25 = vld [vmem:[#allocation2 + $0xc0] sm:$0xff]  ;;  %v1362_v37 = vpack.c.bf16 %v1354_v20, %v1353_v53 }
 0x137   : > { %3505 = vmatprep.subr.msk.bf16.mxu0 %vm1024_vm4, %v3165_v26  ;;  %v1560_v26 = vpack.c.bf16 %v1552_v23, %v1551_v25 }
 0x13b   : > { %3344 = vmatmul.mubr.msk.bf16.gmra.mxu1 %vm952_vm5, %v4141_v8 }
 0x13c   : > { %3362 = vmatmul.mubr.msk.bf16.gmra.mxu0 %vm952_vm5, %v4143_v33  ;;  %3347 = vmatprep.mubr.msk.bf16.mxu1 %vm952_vm5, %v4145_v36 }
 0x13d   : > { %3365 = vmatprep.mubr.msk.bf16.mxu0 %vm952_vm5, %v4147_v41 }
 0x143   : > { %3348 = vmatmul.mubr.msk.bf16.gmra.mxu1 %vm952_vm5, %v4157_v24 }
 0x144   : > { %3366 = vmatmul.mubr.msk.bf16.gmra.mxu0 %vm952_vm5, %v4159_v52  ;;  %3351 = vmatprep.mubr.msk.bf16.mxu1 %vm952_vm5, %v4161_v5 }
 0x145   : > { %3369 = vmatprep.mubr.msk.bf16.mxu0 %vm952_vm5, %v4163_v30 }
 0x14b   : > { %3352 = vmatmul.mubr.msk.bf16.gmra.mxu1 %vm952_vm5, %v4173_v47 }
 0x14c   : > { %3370 = vmatmul.mubr.msk.bf16.gmra.mxu0 %vm952_vm5, %v4175_v1  ;;  %3375 = vmatprep.mubr.msk.bf16.mxu1 %vm952_vm5, %v1355_v21 }
 0x14d   : > { %3393 = vmatprep.mubr.msk.bf16.mxu0 %vm952_vm5, %v4111_v19  ;;  %v4217_v19 = vpack.c.bf16 %v1352_v43, %v1351_v15 }
 0x153   : > { %3376 = vmatmul.mubr.msk.bf16.vlgmr.msra.gmra.mxu1 %vm952_vm5, %v1356_v4 }
 0x154   : > { %3394 = vmatmul.mubr.msk.bf16.vlgmr.msra.gmra.mxu0 %vm952_vm5, %v4119_v22  ;;  %3410 = vmatpush3.bf16.msra.mxu1 %v1786_v6 }
 0x155   : > { %3379 = vmatprep.mubr.msk.bf16.mxu1 %vm952_vm5, %v4185_v7  ;;  %3397 = vmatprep.mubr.msk.bf16.mxu0 %vm952_vm5, %v4141_v8 }
 0x156   : > { %3428 = vmatpush3.bf16.msra.mxu0 %v1984_v12  ;;  %3506 = vmatprep.subr.msk.bf16.mxu1 %vm1024_vm4, %v3174_v44 }
 0x157   : > { %3507 = vmatprep.subr.msk.bf16.mxu0 %vm1024_vm4, %v3183_v17 }
 0x15b   : > { %3380 = vmatmul.mubr.msk.bf16.gmra.mxu1 %vm952_vm5, %v4203_v11 }
 0x15c   : > { %3398 = vmatmul.mubr.msk.bf16.gmra.mxu0 %vm952_vm5, %v4145_v36  ;;  %3383 = vmatprep.mubr.msk.bf16.mxu1 %vm952_vm5, %v4205_v13 }
 0x15d   : > { %3401 = vmatprep.mubr.msk.bf16.mxu0 %vm952_vm5, %v4157_v24 }
 0x163   : > { %3384 = vmatmul.mubr.msk.bf16.gmra.mxu1 %vm952_vm5, %v4215_v18 }
 0x164   : > { %3402 = vmatmul.mubr.msk.bf16.gmra.mxu0 %vm952_vm5, %v4161_v5  ;;  %3387 = vmatprep.mubr.msk.bf16.mxu1 %vm952_vm5, %v4217_v19 }
 0x165   : > { %3405 = vmatprep.mubr.msk.bf16.mxu0 %vm952_vm5, %v4173_v47 }
 0x16b   : > { %3388 = vmatmul.mubr.msk.bf16.gmra.mxu1 %vm952_vm5, %v1362_v37 }
 0x16c   : > { %3406 = vmatmul.mubr.msk.bf16.gmra.mxu0 %vm952_vm5, %v1560_v26  ;;  %3411 = vmatprep.mubr.msk.bf16.mxu1 %vm952_vm5, %v4113_v61  ;;  %v1750_v61 = vld [vmem:[#allocation2 + $0xc9] sm:$0xff] }
 0x16d   : > { %3429 = vmatprep.mubr.msk.bf16.mxu0 %vm952_vm5, %v1356_v4  ;;  %v1758_v34 = vpack.c.bf16 %v1750_v61, %v1749_v32 }
 0x173   : > { %3412 = vmatmul.mubr.msk.bf16.vlgmr.msra.gmra.mxu1 %vm952_vm5, %v4127_v59 }
 0x174   : > { %3430 = vmatmul.mubr.msk.bf16.vlgmr.msra.gmra.mxu0 %vm952_vm5, %v4185_v7  ;;  %3446 = vmatpush3.bf16.msra.mxu1 %v2183_v38 }
 0x175   : > { %3415 = vmatprep.mubr.msk.bf16.mxu1 %vm952_vm5, %v4143_v33  ;;  %3433 = vmatprep.mubr.msk.bf16.mxu0 %vm952_vm5, %v4203_v11 }
 0x176   : > { %3464 = vmatpush3.bf16.msra.mxu0 %v2381_v27  ;;  %3508 = vmatprep.subr.msk.bf16.mxu1 %vm1024_vm4, %v3192_v29 }
 0x17b   : > { %3416 = vmatmul.mubr.msk.bf16.gmra.mxu1 %vm952_vm5, %v4147_v41 }
 0x17c   : > { %3434 = vmatmul.mubr.msk.bf16.gmra.mxu0 %vm952_vm5, %v4205_v13  ;;  %3419 = vmatprep.mubr.msk.bf16.mxu1 %vm952_vm5, %v4159_v52 }
 0x17d   : > { %3437 = vmatprep.mubr.msk.bf16.mxu0 %vm952_vm5, %v4215_v18 }
 0x183   : > { %3420 = vmatmul.mubr.msk.bf16.gmra.mxu1 %vm952_vm5, %v4163_v30 }
 0x184   : > { %3438 = vmatmul.mubr.msk.bf16.gmra.mxu0 %vm952_vm5, %v4217_v19  ;;  %3423 = vmatprep.mubr.msk.bf16.mxu1 %vm952_vm5, %v4175_v1 }
 0x185   : > { %3441 = vmatprep.mubr.msk.bf16.mxu0 %vm952_vm5, %v1362_v37 }
 0x18b   : > { %3424 = vmatmul.mubr.msk.bf16.gmra.mxu1 %vm952_vm5, %v1758_v34 }
 0x18c   : > { %3442 = vmatmul.mubr.msk.bf16.gmra.mxu0 %vm952_vm5, %v1956_v35  ;;  %3447 = vmatprep.mubr.msk.bf16.mxu1 %vm952_vm5, %v4119_v22  ;;  %v2146_v22 = vld [vmem:[#allocation2 + $0xd8] sm:$0xff] }
 0x18d   : > { %3465 = vmatprep.mubr.msk.bf16.mxu0 %vm952_vm5, %v4127_v59  ;;  %v2147_v59 = vld [vmem:[#allocation2 + $0xe0] sm:$0xff] }
 0x193   : > { %3448 = vmatmul.mubr.msk.bf16.vlgmr.msra.gmra.mxu1 %vm952_vm5, %v4141_v8  ;;  %v2344_v8 = vld [vmem:[#allocation2 + $0xd9] sm:$0xff] }
 0x194   : > { %3466 = vmatmul.mubr.msk.bf16.vlgmr.msra.gmra.mxu0 %vm952_vm5, %v4143_v33  ;;  %3482 = vmatpush3.bf16.msra.mxu1 %v2579_v45  ;;  %v2345_v33 = vld [vmem:[#allocation2 + $0xe1] sm:$0xff] }
 0x195   : > { %3451 = vmatprep.mubr.msk.bf16.mxu1 %vm952_vm5, %v4145_v36  ;;  %3469 = vmatprep.mubr.msk.bf16.mxu0 %vm952_vm5, %v4147_v41  ;;  %v2155_v36 = vpack.c.bf16 %v2147_v59, %v2146_v22  ;;  %v2353_v41 = vpack.c.bf16 %v2345_v33, %v2344_v8 }
 0x19b   : > { %3452 = vmatmul.mubr.msk.bf16.gmra.mxu1 %vm952_vm5, %v4157_v24 }
 0x19c   : > { %3470 = vmatmul.mubr.msk.bf16.gmra.mxu0 %vm952_vm5, %v4159_v52  ;;  %3455 = vmatprep.mubr.msk.bf16.mxu1 %vm952_vm5, %v4161_v5 }
 0x19d   : > { %3473 = vmatprep.mubr.msk.bf16.mxu0 %vm952_vm5, %v4163_v30 }
 0x1a3   : > { %3456 = vmatmul.mubr.msk.bf16.gmra.mxu1 %vm952_vm5, %v4173_v47 }
 0x1a4   : > { %3474 = vmatmul.mubr.msk.bf16.gmra.mxu0 %vm952_vm5, %v4175_v1  ;;  %3459 = vmatprep.mubr.msk.bf16.mxu1 %vm952_vm5, %v1560_v26 }
 0x1a5   : > { %3477 = vmatprep.mubr.msk.bf16.mxu0 %vm952_vm5, %v1758_v34 }
 0x1ab   : > { %3460 = vmatmul.mubr.msk.bf16.gmra.mxu1 %vm952_vm5, %v2155_v36 }
 0x1ac   : > { %3478 = vmatmul.mubr.msk.bf16.gmra.mxu0 %vm952_vm5, %v2353_v41  ;;  %3483 = vmatprep.mubr.msk.bf16.mxu1 %vm952_vm5, %v4185_v7 }
 0x1b3   : > { %3484 = vmatmul.mubr.msk.bf16.vlgmr.msra.gmra.mxu1 %vm952_vm5, %v4203_v11 }
 0x1b4   : > { %3487 = vmatprep.mubr.msk.bf16.mxu1 %vm952_vm5, %v4205_v13 }
 0x1bb   : > { %3488 = vmatmul.mubr.msk.bf16.gmra.mxu1 %vm952_vm5, %v4215_v18 }
 0x1bc   : > { %3491 = vmatprep.mubr.msk.bf16.mxu1 %vm952_vm5, %v4217_v19 }
 0x1c3   : > { %3492 = vmatmul.mubr.msk.bf16.gmra.mxu1 %vm952_vm5, %v1362_v37 }
 0x1c4   : > { %3495 = vmatprep.mubr.msk.bf16.mxu1 %vm952_vm5, %v1956_v35 }
 0x1cb   : > { %3496 = vmatmul.mubr.msk.bf16.gmra.mxu1 %vm952_vm5, %v2551_v49 }
 0x1f3   : > { %v3341_v50 = vpop.f32.mrf.mxu1 }
 0x1f4   : > { %v3359_v51 = vpop.f32.mrf.mxu0  ;;  %1127 = vst.msk [vmem:[%s4310_s29 + $0x10] sm:$0xff] %vm529_vm2, %v3341_v50 }
 0x1f5   : > { %v1062_v24 = vpop.f32.mrf.mxu1 }
 0x1f6   : > { %v1228_v52 = vpop.f32.mrf.mxu0  ;;  %1125 = vst.msk [vmem:[%s4310_s29] sm:$0xff] %vm529_vm2, %v1062_v24 }
 0x1f7   : > { %v3342_v54 = vpop.f32.mrf.mxu1 }
 0x1f8   : > { %v3360_v55 = vpop.f32.mrf.mxu0  ;;  %1128 = vst.msk [vmem:[%s4310_s29 + $0x18] sm:$0xff] %vm529_vm2, %v3342_v54 }
 0x1f9   : > { %v1065_v5 = vpop.f32.mrf.mxu1 }
 0x1fa   : > { %v1231_v30 = vpop.f32.mrf.mxu0  ;;  %1126 = vst.msk [vmem:[%s4310_s29 + $0x8] sm:$0xff] %vm529_vm2, %v1065_v5 }
 0x1fb   : > { %v1293_v56 = vld [vmem:[%s4310_s29 + $0x10] sm:$0xff]  ;;  %v3345_v57 = vpop.f32.mrf.mxu1 }
 0x1fc   : > { %v3363_v42 = vpop.f32.mrf.mxu0  ;;  %v1309_v58 = vadd.f32 %v3359_v51, %v1293_v56  ;;  %1131 = vst.msk [vmem:[%s4310_s29 + $0x30] sm:$0xff] %vm529_vm2, %v3345_v57 }
 0x1fd   : > { %v1291_v62 = vld [vmem:[%s4310_s29] sm:$0xff]  ;;  %v1078_v63 = vpop.f32.mrf.mxu1 }
 0x1fe   : > { %v1244_v47 = vpop.f32.mrf.mxu0  ;;  %1325 = vst.msk [vmem:[%s4310_s29 + $0x10] sm:$0xff] %vm529_vm2, %v1309_v58  ;;  %v1307_v1 = vadd.f32 %v1291_v62, %v1228_v52  ;;  %1129 = vst.msk [vmem:[%s4310_s29 + $0x20] sm:$0xff] %vm529_vm2, %v1078_v63 }
 0x1ff   : > { %v1294_v21 = vld [vmem:[%s4310_s29 + $0x18] sm:$0xff]  ;;  %v3346_v60 = vpop.f32.mrf.mxu1 }
 0x200   : > { %v3364_v0 = vpop.f32.mrf.mxu0  ;;  %1323 = vst.msk [vmem:[%s4310_s29] sm:$0xff] %vm529_vm2, %v1307_v1  ;;  %v1310_v2 = vadd.f32 %v3360_v55, %v1294_v21  ;;  %1132 = vst.msk [vmem:[%s4310_s29 + $0x38] sm:$0xff] %vm529_vm2, %v3346_v60 }
 0x201   : > { %v1292_v39 = vld [vmem:[%s4310_s29 + $0x8] sm:$0xff]  ;;  %v1081_v4 = vpop.f32.mrf.mxu1 }
 0x202   : > { %v1247_v6 = vpop.f32.mrf.mxu0  ;;  %1326 = vst.msk [vmem:[%s4310_s29 + $0x18] sm:$0xff] %vm529_vm2, %v1310_v2  ;;  %v1308_v7 = vadd.f32 %v1292_v39, %v1231_v30  ;;  %1130 = vst.msk [vmem:[%s4310_s29 + $0x28] sm:$0xff] %vm529_vm2, %v1081_v4 }
 0x203   : > { %v1297_v12 = vld [vmem:[%s4310_s29 + $0x30] sm:$0xff]  ;;  %v3349_v44 = vpop.f32.mrf.mxu1 }
 0x204   : > { %v3367_v17 = vpop.f32.mrf.mxu0  ;;  %1324 = vst.msk [vmem:[%s4310_s29 + $0x8] sm:$0xff] %vm529_vm2, %v1308_v7  ;;  %v1313_v40 = vadd.f32 %v3363_v42, %v1297_v12  ;;  %1135 = vst.msk [vmem:[%s4310_s29 + $0x50] sm:$0xff] %vm529_vm2, %v3349_v44 }
 0x205   : > { %v1295_v9 = vld [vmem:[%s4310_s29 + $0x20] sm:$0xff]  ;;  %v1094_v10 = vpop.f32.mrf.mxu1  ;;  %v1491_v33 = vld [vmem:[%s4310_s29 + $0x10] sm:$0xff] }
 0x206   : > { %v1260_v28 = vpop.f32.mrf.mxu0  ;;  %1329 = vst.msk [vmem:[%s4310_s29 + $0x30] sm:$0xff] %vm529_vm2, %v1313_v40  ;;  %v1311_v11 = vadd.f32 %v1295_v9, %v1244_v47  ;;  %1133 = vst.msk [vmem:[%s4310_s29 + $0x40] sm:$0xff] %vm529_vm2, %v1094_v10 }
 0x207   : > { %v1298_v13 = vld [vmem:[%s4310_s29 + $0x38] sm:$0xff]  ;;  %v3350_v14 = vpop.f32.mrf.mxu1  ;;  %v1489_v50 = vld [vmem:[%s4310_s29] sm:$0xff] }
 0x208   : > { %v3368_v48 = vpop.f32.mrf.mxu0  ;;  %1327 = vst.msk [vmem:[%s4310_s29 + $0x20] sm:$0xff] %vm529_vm2, %v1311_v11  ;;  %v1314_v15 = vadd.f32 %v3364_v0, %v1298_v13  ;;  %1136 = vst.msk [vmem:[%s4310_s29 + $0x58] sm:$0xff] %vm529_vm2, %v3350_v14 }
 0x209   : > { %v1296_v43 = vld [vmem:[%s4310_s29 + $0x28] sm:$0xff]  ;;  %v1097_v18 = vpop.f32.mrf.mxu1  ;;  %v1492_v5 = vld [vmem:[%s4310_s29 + $0x18] sm:$0xff] }
 0x20a   : > { %v1263_v19 = vpop.f32.mrf.mxu0  ;;  %1330 = vst.msk [vmem:[%s4310_s29 + $0x38] sm:$0xff] %vm529_vm2, %v1314_v15  ;;  %v1312_v53 = vadd.f32 %v1296_v43, %v1247_v6  ;;  %1134 = vst.msk [vmem:[%s4310_s29 + $0x48] sm:$0xff] %vm529_vm2, %v1097_v18 }
 0x20b   : > { %v1301_v20 = vld [vmem:[%s4310_s29 + $0x50] sm:$0xff]  ;;  %v3353_v23 = vpop.f32.mrf.mxu1  ;;  %v1490_v62 = vld [vmem:[%s4310_s29 + $0x8] sm:$0xff] }
 0x20c   : > { %v3371_v25 = vpop.f32.mrf.mxu0  ;;  %1328 = vst.msk [vmem:[%s4310_s29 + $0x28] sm:$0xff] %vm529_vm2, %v1312_v53  ;;  %v1317_v37 = vadd.f32 %v3367_v17, %v1301_v20  ;;  %1139 = vst.msk [vmem:[%s4310_s29 + $0x70] sm:$0xff] %vm529_vm2, %v3353_v23 }
 0x20d   : > { %v1299_v26 = vld [vmem:[%s4310_s29 + $0x40] sm:$0xff]  ;;  %v1110_v38 = vpop.f32.mrf.mxu1  ;;  %v1495_v60 = vld [vmem:[%s4310_s29 + $0x30] sm:$0xff] }
 0x20e   : > { %v1276_v27 = vpop.f32.mrf.mxu0  ;;  %1333 = vst.msk [vmem:[%s4310_s29 + $0x50] sm:$0xff] %vm529_vm2, %v1317_v37  ;;  %v1315_v29 = vadd.f32 %v1299_v26, %v1260_v28  ;;  %1137 = vst.msk [vmem:[%s4310_s29 + $0x60] sm:$0xff] %vm529_vm2, %v1110_v38 }
 0x20f   : > { %v1302_v61 = vld [vmem:[%s4310_s29 + $0x58] sm:$0xff]  ;;  %v3354_v31 = vpop.f32.mrf.mxu1  ;;  %v1493_v6 = vld [vmem:[%s4310_s29 + $0x20] sm:$0xff] }
 0x210   : > { %v3372_v3 = vpop.f32.mrf.mxu0  ;;  %1331 = vst.msk [vmem:[%s4310_s29 + $0x40] sm:$0xff] %vm529_vm2, %v1315_v29  ;;  %v1318_v32 = vadd.f32 %v3368_v48, %v1302_v61  ;;  %1140 = vst.msk [vmem:[%s4310_s29 + $0x78] sm:$0xff] %vm529_vm2, %v3354_v31 }
 0x211   : > { %v1300_v34 = vld [vmem:[%s4310_s29 + $0x48] sm:$0xff]  ;;  %v1113_v35 = vpop.f32.mrf.mxu1  ;;  %v1496_v9 = vld [vmem:[%s4310_s29 + $0x38] sm:$0xff] }
 0x212   : > { %v1279_v45 = vpop.f32.mrf.mxu0  ;;  %1334 = vst.msk [vmem:[%s4310_s29 + $0x58] sm:$0xff] %vm529_vm2, %v1318_v32  ;;  %v1316_v22 = vadd.f32 %v1300_v34, %v1263_v19  ;;  %1138 = vst.msk [vmem:[%s4310_s29 + $0x68] sm:$0xff] %vm529_vm2, %v1113_v35 }
 0x213   : > { %v1305_v59 = vld [vmem:[%s4310_s29 + $0x70] sm:$0xff]  ;;  %v3377_v8 = vpop.f32.mrf.mxu1  ;;  %v1494_v48 = vld [vmem:[%s4310_s29 + $0x28] sm:$0xff] }
 0x214   : > { %v3395_v36 = vpop.f32.mrf.mxu0  ;;  %1332 = vst.msk [vmem:[%s4310_s29 + $0x48] sm:$0xff] %vm529_vm2, %v1316_v22  ;;  %v1321_v41 = vadd.f32 %v3371_v25, %v1305_v59  ;;  %v1507_v16 = vadd.f32 %v3377_v8, %v1491_v33 }
 0x215   : > { %v1303_v46 = vld [vmem:[%s4310_s29 + $0x60] sm:$0xff]  ;;  %v1426_v49 = vpop.f32.mrf.mxu1  ;;  %v1499_v20 = vld [vmem:[%s4310_s29 + $0x50] sm:$0xff] }
 0x216   : > { %v1624_v51 = vpop.f32.mrf.mxu0  ;;  %1337 = vst.msk [vmem:[%s4310_s29 + $0x70] sm:$0xff] %vm529_vm2, %v1321_v41  ;;  %v1319_v24 = vadd.f32 %v1303_v46, %v1276_v27  ;;  %1523 = vst.msk [vmem:[%s4310_s29 + $0x10] sm:$0xff] %vm529_vm2, %v1507_v16  ;;  %v1505_v52 = vadd.f32 %v1489_v50, %v1426_v49 }
 0x217   : > { %v1306_v54 = vld [vmem:[%s4310_s29 + $0x78] sm:$0xff]  ;;  %v3378_v55 = vpop.f32.mrf.mxu1  ;;  %v1497_v27 = vld [vmem:[%s4310_s29 + $0x40] sm:$0xff] }
 0x218   : > { %v3396_v30 = vpop.f32.mrf.mxu0  ;;  %1335 = vst.msk [vmem:[%s4310_s29 + $0x60] sm:$0xff] %vm529_vm2, %v1319_v24  ;;  %v1322_v56 = vadd.f32 %v3372_v3, %v1306_v54  ;;  %1521 = vst.msk [vmem:[%s4310_s29] sm:$0xff] %vm529_vm2, %v1505_v52  ;;  %v1508_v57 = vadd.f32 %v3378_v55, %v1492_v5 }
 0x219   : > { %v1304_v42 = vld [vmem:[%s4310_s29 + $0x68] sm:$0xff]  ;;  %v1429_v58 = vpop.f32.mrf.mxu1  ;;  %v1500_v34 = vld [vmem:[%s4310_s29 + $0x58] sm:$0xff] }
 0x21a   : > { %v1627_v63 = vpop.f32.mrf.mxu0  ;;  %1338 = vst.msk [vmem:[%s4310_s29 + $0x78] sm:$0xff] %vm529_vm2, %v1322_v56  ;;  %v1320_v47 = vadd.f32 %v1304_v42, %v1279_v45  ;;  %1524 = vst.msk [vmem:[%s4310_s29 + $0x18] sm:$0xff] %vm529_vm2, %v1508_v57  ;;  %v1506_v1 = vadd.f32 %v1490_v62, %v1429_v58 }
 0x21b   : > { %v3381_v21 = vpop.f32.mrf.mxu1  ;;  %v1498_v33 = vld [vmem:[%s4310_s29 + $0x48] sm:$0xff] }
 0x21c   : > { %v3399_v0 = vpop.f32.mrf.mxu0  ;;  %1336 = vst.msk [vmem:[%s4310_s29 + $0x68] sm:$0xff] %vm529_vm2, %v1320_v47  ;;  %1522 = vst.msk [vmem:[%s4310_s29 + $0x8] sm:$0xff] %vm529_vm2, %v1506_v1  ;;  %v1511_v2 = vadd.f32 %v3381_v21, %v1495_v60 }
 0x21d   : > { %v1689_v39 = vld [vmem:[%s4310_s29 + $0x10] sm:$0xff]  ;;  %v1442_v4 = vpop.f32.mrf.mxu1 }
 0x21e   : > { %v1640_v7 = vpop.f32.mrf.mxu0  ;;  %v1705_v12 = vadd.f32 %v3395_v36, %v1689_v39  ;;  %1527 = vst.msk [vmem:[%s4310_s29 + $0x30] sm:$0xff] %vm529_vm2, %v1511_v2  ;;  %v1509_v44 = vadd.f32 %v1493_v6, %v1442_v4  ;;  %v1503_v50 = vld [vmem:[%s4310_s29 + $0x70] sm:$0xff] }
 0x21f   : > { %v1687_v17 = vld [vmem:[%s4310_s29] sm:$0xff]  ;;  %v3382_v40 = vpop.f32.mrf.mxu1 }
 0x220   : > { %v3400_v10 = vpop.f32.mrf.mxu0  ;;  %1721 = vst.msk [vmem:[%s4310_s29 + $0x10] sm:$0xff] %vm529_vm2, %v1705_v12  ;;  %v1703_v28 = vadd.f32 %v1687_v17, %v1624_v51  ;;  %1525 = vst.msk [vmem:[%s4310_s29 + $0x20] sm:$0xff] %vm529_vm2, %v1509_v44  ;;  %v1512_v11 = vadd.f32 %v3382_v40, %v1496_v9  ;;  %v1501_v5 = vld [vmem:[%s4310_s29 + $0x60] sm:$0xff] }
 0x221   : > { %v1690_v13 = vld [vmem:[%s4310_s29 + $0x18] sm:$0xff]  ;;  %v1445_v14 = vpop.f32.mrf.mxu1 }
 0x222   : > { %v1643_v15 = vpop.f32.mrf.mxu0  ;;  %1719 = vst.msk [vmem:[%s4310_s29] sm:$0xff] %vm529_vm2, %v1703_v28  ;;  %v1706_v43 = vadd.f32 %v3396_v30, %v1690_v13  ;;  %1528 = vst.msk [vmem:[%s4310_s29 + $0x38] sm:$0xff] %vm529_vm2, %v1512_v11  ;;  %v1510_v18 = vadd.f32 %v1494_v48, %v1445_v14  ;;  %v1504_v62 = vld [vmem:[%s4310_s29 + $0x78] sm:$0xff] }
 0x223   : > { %v1688_v19 = vld [vmem:[%s4310_s29 + $0x8] sm:$0xff]  ;;  %v3385_v53 = vpop.f32.mrf.mxu1 }
 0x224   : > { %v3403_v23 = vpop.f32.mrf.mxu0  ;;  %1722 = vst.msk [vmem:[%s4310_s29 + $0x18] sm:$0xff] %vm529_vm2, %v1706_v43  ;;  %v1704_v25 = vadd.f32 %v1688_v19, %v1627_v63  ;;  %1526 = vst.msk [vmem:[%s4310_s29 + $0x28] sm:$0xff] %vm529_vm2, %v1510_v18  ;;  %v1515_v37 = vadd.f32 %v3385_v53, %v1499_v20 }
 0x225   : > { %v1693_v26 = vld [vmem:[%s4310_s29 + $0x30] sm:$0xff]  ;;  %v1458_v38 = vpop.f32.mrf.mxu1 }
 0x226   : > { %v1656_v29 = vpop.f32.mrf.mxu0  ;;  %1720 = vst.msk [vmem:[%s4310_s29 + $0x8] sm:$0xff] %vm529_vm2, %v1704_v25  ;;  %v1709_v61 = vadd.f32 %v3399_v0, %v1693_v26  ;;  %1531 = vst.msk [vmem:[%s4310_s29 + $0x50] sm:$0xff] %vm529_vm2, %v1515_v37  ;;  %v1513_v31 = vadd.f32 %v1497_v27, %v1458_v38  ;;  %v1502_v0 = vld [vmem:[%s4310_s29 + $0x68] sm:$0xff] }
 0x227   : > { %v1691_v3 = vld [vmem:[%s4310_s29 + $0x20] sm:$0xff]  ;;  %v3386_v32 = vpop.f32.mrf.mxu1  ;;  %v1887_v12 = vld [vmem:[%s4310_s29 + $0x10] sm:$0xff] }
 0x228   : > { %v3404_v35 = vpop.f32.mrf.mxu0  ;;  %1725 = vst.msk [vmem:[%s4310_s29 + $0x30] sm:$0xff] %vm529_vm2, %v1709_v61  ;;  %v1707_v45 = vadd.f32 %v1691_v3, %v1640_v7  ;;  %1529 = vst.msk [vmem:[%s4310_s29 + $0x40] sm:$0xff] %vm529_vm2, %v1513_v31  ;;  %v1516_v22 = vadd.f32 %v3386_v32, %v1500_v34 }
 0x229   : > { %v1694_v59 = vld [vmem:[%s4310_s29 + $0x38] sm:$0xff]  ;;  %v1461_v8 = vpop.f32.mrf.mxu1  ;;  %v1885_v28 = vld [vmem:[%s4310_s29] sm:$0xff] }
 0x22a   : > { %v1659_v36 = vpop.f32.mrf.mxu0  ;;  %1723 = vst.msk [vmem:[%s4310_s29 + $0x20] sm:$0xff] %vm529_vm2, %v1707_v45  ;;  %v1710_v41 = vadd.f32 %v3400_v10, %v1694_v59  ;;  %1532 = vst.msk [vmem:[%s4310_s29 + $0x58] sm:$0xff] %vm529_vm2, %v1516_v22  ;;  %v1514_v16 = vadd.f32 %v1498_v33, %v1461_v8 }
 0x22b   : > { %v1692_v46 = vld [vmem:[%s4310_s29 + $0x28] sm:$0xff]  ;;  %v3389_v49 = vpop.f32.mrf.mxu1  ;;  %v1888_v43 = vld [vmem:[%s4310_s29 + $0x18] sm:$0xff] }
 0x22c   : > { %v3407_v51 = vpop.f32.mrf.mxu0  ;;  %1726 = vst.msk [vmem:[%s4310_s29 + $0x38] sm:$0xff] %vm529_vm2, %v1710_v41  ;;  %v1708_v24 = vadd.f32 %v1692_v46, %v1643_v15  ;;  %1530 = vst.msk [vmem:[%s4310_s29 + $0x48] sm:$0xff] %vm529_vm2, %v1514_v16  ;;  %v1519_v52 = vadd.f32 %v3389_v49, %v1503_v50 }
 0x22d   : > { %v1697_v54 = vld [vmem:[%s4310_s29 + $0x50] sm:$0xff]  ;;  %v1474_v55 = vpop.f32.mrf.mxu1  ;;  %v1886_v25 = vld [vmem:[%s4310_s29 + $0x8] sm:$0xff] }
 0x22e   : > { %v1672_v30 = vpop.f32.mrf.mxu0  ;;  %1724 = vst.msk [vmem:[%s4310_s29 + $0x28] sm:$0xff] %vm529_vm2, %v1708_v24  ;;  %v1713_v56 = vadd.f32 %v3403_v23, %v1697_v54  ;;  %1535 = vst.msk [vmem:[%s4310_s29 + $0x70] sm:$0xff] %vm529_vm2, %v1519_v52  ;;  %v1517_v57 = vadd.f32 %v1501_v5, %v1474_v55 }
 0x22f   : > { %v1695_v42 = vld [vmem:[%s4310_s29 + $0x40] sm:$0xff]  ;;  %v3390_v58 = vpop.f32.mrf.mxu1  ;;  %v1891_v61 = vld [vmem:[%s4310_s29 + $0x30] sm:$0xff] }
 0x230   : > { %v3408_v63 = vpop.f32.mrf.mxu0  ;;  %1729 = vst.msk [vmem:[%s4310_s29 + $0x50] sm:$0xff] %vm529_vm2, %v1713_v56  ;;  %v1711_v47 = vadd.f32 %v1695_v42, %v1656_v29  ;;  %1533 = vst.msk [vmem:[%s4310_s29 + $0x60] sm:$0xff] %vm529_vm2, %v1517_v57  ;;  %v1520_v1 = vadd.f32 %v3390_v58, %v1504_v62 }
 0x231   : > { %v1698_v21 = vld [vmem:[%s4310_s29 + $0x58] sm:$0xff]  ;;  %v1477_v60 = vpop.f32.mrf.mxu1  ;;  %v1889_v45 = vld [vmem:[%s4310_s29 + $0x20] sm:$0xff] }
 0x232   : > { %v1675_v2 = vpop.f32.mrf.mxu0  ;;  %1727 = vst.msk [vmem:[%s4310_s29 + $0x40] sm:$0xff] %vm529_vm2, %v1711_v47  ;;  %v1714_v39 = vadd.f32 %v3404_v35, %v1698_v21  ;;  %1536 = vst.msk [vmem:[%s4310_s29 + $0x78] sm:$0xff] %vm529_vm2, %v1520_v1  ;;  %v1518_v4 = vadd.f32 %v1502_v0, %v1477_v60 }
 0x233   : > { %v1696_v6 = vld [vmem:[%s4310_s29 + $0x48] sm:$0xff]  ;;  %v3413_v7 = vpop.f32.mrf.mxu1  ;;  %v1892_v41 = vld [vmem:[%s4310_s29 + $0x38] sm:$0xff] }
 0x234   : > { %v3431_v44 = vpop.f32.mrf.mxu0  ;;  %1730 = vst.msk [vmem:[%s4310_s29 + $0x58] sm:$0xff] %vm529_vm2, %v1714_v39  ;;  %v1712_v17 = vadd.f32 %v1696_v6, %v1659_v36  ;;  %1534 = vst.msk [vmem:[%s4310_s29 + $0x68] sm:$0xff] %vm529_vm2, %v1518_v4  ;;  %v1903_v40 = vadd.f32 %v3413_v7, %v1887_v12 }
 0x235   : > { %v1701_v9 = vld [vmem:[%s4310_s29 + $0x70] sm:$0xff]  ;;  %v1822_v10 = vpop.f32.mrf.mxu1  ;;  %v1890_v24 = vld [vmem:[%s4310_s29 + $0x28] sm:$0xff] }
 0x236   : > { %v2020_v11 = vpop.f32.mrf.mxu0  ;;  %1728 = vst.msk [vmem:[%s4310_s29 + $0x48] sm:$0xff] %vm529_vm2, %v1712_v17  ;;  %v1717_v13 = vadd.f32 %v3407_v51, %v1701_v9  ;;  %1919 = vst.msk [vmem:[%s4310_s29 + $0x10] sm:$0xff] %vm529_vm2, %v1903_v40  ;;  %v1901_v14 = vadd.f32 %v1885_v28, %v1822_v10 }
 0x237   : > { %v1699_v48 = vld [vmem:[%s4310_s29 + $0x60] sm:$0xff]  ;;  %v3414_v15 = vpop.f32.mrf.mxu1  ;;  %v1895_v56 = vld [vmem:[%s4310_s29 + $0x50] sm:$0xff] }
 0x238   : > { %v3432_v18 = vpop.f32.mrf.mxu0  ;;  %1733 = vst.msk [vmem:[%s4310_s29 + $0x70] sm:$0xff] %vm529_vm2, %v1717_v13  ;;  %v1715_v19 = vadd.f32 %v1699_v48, %v1672_v30  ;;  %1917 = vst.msk [vmem:[%s4310_s29] sm:$0xff] %vm529_vm2, %v1901_v14  ;;  %v1904_v53 = vadd.f32 %v3414_v15, %v1888_v43 }
 0x239   : > { %v1702_v20 = vld [vmem:[%s4310_s29 + $0x78] sm:$0xff]  ;;  %v1825_v23 = vpop.f32.mrf.mxu1  ;;  %v1893_v47 = vld [vmem:[%s4310_s29 + $0x40] sm:$0xff] }
 0x23a   : > { %v2023_v37 = vpop.f32.mrf.mxu0  ;;  %1731 = vst.msk [vmem:[%s4310_s29 + $0x60] sm:$0xff] %vm529_vm2, %v1715_v19  ;;  %v1718_v26 = vadd.f32 %v3408_v63, %v1702_v20  ;;  %1920 = vst.msk [vmem:[%s4310_s29 + $0x18] sm:$0xff] %vm529_vm2, %v1904_v53  ;;  %v1902_v38 = vadd.f32 %v1886_v25, %v1825_v23 }
 0x23b   : > { %v1700_v27 = vld [vmem:[%s4310_s29 + $0x68] sm:$0xff]  ;;  %v3417_v29 = vpop.f32.mrf.mxu1  ;;  %v1896_v39 = vld [vmem:[%s4310_s29 + $0x58] sm:$0xff] }
 0x23c   : > { %v3435_v31 = vpop.f32.mrf.mxu0  ;;  %1734 = vst.msk [vmem:[%s4310_s29 + $0x78] sm:$0xff] %vm529_vm2, %v1718_v26  ;;  %v1716_v3 = vadd.f32 %v1700_v27, %v1675_v2  ;;  %1918 = vst.msk [vmem:[%s4310_s29 + $0x8] sm:$0xff] %vm529_vm2, %v1902_v38  ;;  %v1907_v32 = vadd.f32 %v3417_v29, %v1891_v61 }
 0x23d   : > { %v2085_v34 = vld [vmem:[%s4310_s29 + $0x10] sm:$0xff]  ;;  %v1838_v35 = vpop.f32.mrf.mxu1  ;;  %v1894_v17 = vld [vmem:[%s4310_s29 + $0x48] sm:$0xff] }
 0x23e   : > { %v2036_v22 = vpop.f32.mrf.mxu0  ;;  %1732 = vst.msk [vmem:[%s4310_s29 + $0x68] sm:$0xff] %vm529_vm2, %v1716_v3  ;;  %v2101_v59 = vadd.f32 %v3431_v44, %v2085_v34  ;;  %1923 = vst.msk [vmem:[%s4310_s29 + $0x30] sm:$0xff] %vm529_vm2, %v1907_v32  ;;  %v1905_v8 = vadd.f32 %v1889_v45, %v1838_v35 }
 0x23f   : > { %v2083_v33 = vld [vmem:[%s4310_s29] sm:$0xff]  ;;  %v3418_v36 = vpop.f32.mrf.mxu1  ;;  %v1899_v13 = vld [vmem:[%s4310_s29 + $0x70] sm:$0xff] }
 0x240   : > { %v3436_v16 = vpop.f32.mrf.mxu0  ;;  %2117 = vst.msk [vmem:[%s4310_s29 + $0x10] sm:$0xff] %vm529_vm2, %v2101_v59  ;;  %v2099_v46 = vadd.f32 %v2083_v33, %v2020_v11  ;;  %1921 = vst.msk [vmem:[%s4310_s29 + $0x20] sm:$0xff] %vm529_vm2, %v1905_v8  ;;  %v1908_v49 = vadd.f32 %v3418_v36, %v1892_v41 }
 0x241   : > { %v2086_v50 = vld [vmem:[%s4310_s29 + $0x18] sm:$0xff]  ;;  %v1841_v51 = vpop.f32.mrf.mxu1  ;;  %v1897_v19 = vld [vmem:[%s4310_s29 + $0x60] sm:$0xff] }
 0x242   : > { %v2039_v52 = vpop.f32.mrf.mxu0  ;;  %2115 = vst.msk [vmem:[%s4310_s29] sm:$0xff] %vm529_vm2, %v2099_v46  ;;  %v2102_v54 = vadd.f32 %v3432_v18, %v2086_v50  ;;  %1924 = vst.msk [vmem:[%s4310_s29 + $0x38] sm:$0xff] %vm529_vm2, %v1908_v49  ;;  %v1906_v55 = vadd.f32 %v1890_v24, %v1841_v51 }
 0x243   : > { %v2084_v5 = vld [vmem:[%s4310_s29 + $0x8] sm:$0xff]  ;;  %v3421_v30 = vpop.f32.mrf.mxu1  ;;  %v1900_v26 = vld [vmem:[%s4310_s29 + $0x78] sm:$0xff] }
 0x244   : > { %v3439_v57 = vpop.f32.mrf.mxu0  ;;  %2118 = vst.msk [vmem:[%s4310_s29 + $0x18] sm:$0xff] %vm529_vm2, %v2102_v54  ;;  %v2100_v42 = vadd.f32 %v2084_v5, %v2023_v37  ;;  %1922 = vst.msk [vmem:[%s4310_s29 + $0x28] sm:$0xff] %vm529_vm2, %v1906_v55  ;;  %v1911_v58 = vadd.f32 %v3421_v30, %v1895_v56 }
 0x245   : > { %v2089_v62 = vld [vmem:[%s4310_s29 + $0x30] sm:$0xff]  ;;  %v1854_v63 = vpop.f32.mrf.mxu1  ;;  %v1898_v3 = vld [vmem:[%s4310_s29 + $0x68] sm:$0xff] }
 0x246   : > { %v2052_v1 = vpop.f32.mrf.mxu0  ;;  %2116 = vst.msk [vmem:[%s4310_s29 + $0x8] sm:$0xff] %vm529_vm2, %v2100_v42  ;;  %v2105_v21 = vadd.f32 %v3435_v31, %v2089_v62  ;;  %1927 = vst.msk [vmem:[%s4310_s29 + $0x50] sm:$0xff] %vm529_vm2, %v1911_v58  ;;  %v1909_v60 = vadd.f32 %v1893_v47, %v1854_v63 }
 0x247   : > { %v2087_v0 = vld [vmem:[%s4310_s29 + $0x20] sm:$0xff]  ;;  %v3422_v2 = vpop.f32.mrf.mxu1  ;;  %v2284_v59 = vld [vmem:[%s4310_s29 + $0x10] sm:$0xff] }
 0x248   : > { %v3440_v4 = vpop.f32.mrf.mxu0  ;;  %2121 = vst.msk [vmem:[%s4310_s29 + $0x30] sm:$0xff] %vm529_vm2, %v2105_v21  ;;  %v2103_v6 = vadd.f32 %v2087_v0, %v2036_v22  ;;  %1925 = vst.msk [vmem:[%s4310_s29 + $0x40] sm:$0xff] %vm529_vm2, %v1909_v60  ;;  %v1912_v7 = vadd.f32 %v3422_v2, %v1896_v39 }
 0x249   : > { %v2090_v12 = vld [vmem:[%s4310_s29 + $0x38] sm:$0xff]  ;;  %v1857_v44 = vpop.f32.mrf.mxu1  ;;  %v2282_v46 = vld [vmem:[%s4310_s29] sm:$0xff] }
 0x24a   : > { %v2055_v40 = vpop.f32.mrf.mxu0  ;;  %2119 = vst.msk [vmem:[%s4310_s29 + $0x20] sm:$0xff] %vm529_vm2, %v2103_v6  ;;  %v2106_v9 = vadd.f32 %v3436_v16, %v2090_v12  ;;  %1928 = vst.msk [vmem:[%s4310_s29 + $0x58] sm:$0xff] %vm529_vm2, %v1912_v7  ;;  %v1910_v10 = vadd.f32 %v1894_v17, %v1857_v44 }
 0x24b   : > { %v2088_v28 = vld [vmem:[%s4310_s29 + $0x28] sm:$0xff]  ;;  %v3425_v11 = vpop.f32.mrf.mxu1  ;;  %v2285_v54 = vld [vmem:[%s4310_s29 + $0x18] sm:$0xff] }
 0x24c   : > { %v3443_v14 = vpop.f32.mrf.mxu0  ;;  %2122 = vst.msk [vmem:[%s4310_s29 + $0x38] sm:$0xff] %vm529_vm2, %v2106_v9  ;;  %v2104_v48 = vadd.f32 %v2088_v28, %v2039_v52  ;;  %1926 = vst.msk [vmem:[%s4310_s29 + $0x48] sm:$0xff] %vm529_vm2, %v1910_v10  ;;  %v1915_v15 = vadd.f32 %v3425_v11, %v1899_v13 }
 0x24d   : > { %v2093_v43 = vld [vmem:[%s4310_s29 + $0x50] sm:$0xff]  ;;  %v1870_v18 = vpop.f32.mrf.mxu1  ;;  %v2283_v42 = vld [vmem:[%s4310_s29 + $0x8] sm:$0xff] }
 0x24e   : > { %v2068_v53 = vpop.f32.mrf.mxu0  ;;  %2120 = vst.msk [vmem:[%s4310_s29 + $0x28] sm:$0xff] %vm529_vm2, %v2104_v48  ;;  %v2109_v20 = vadd.f32 %v3439_v57, %v2093_v43  ;;  %1931 = vst.msk [vmem:[%s4310_s29 + $0x70] sm:$0xff] %vm529_vm2, %v1915_v15  ;;  %v1913_v23 = vadd.f32 %v1897_v19, %v1870_v18 }
 0x24f   : > { %v2091_v25 = vld [vmem:[%s4310_s29 + $0x40] sm:$0xff]  ;;  %v3426_v37 = vpop.f32.mrf.mxu1  ;;  %v2288_v21 = vld [vmem:[%s4310_s29 + $0x30] sm:$0xff] }
 0x250   : > { %v3444_v38 = vpop.f32.mrf.mxu0  ;;  %2125 = vst.msk [vmem:[%s4310_s29 + $0x50] sm:$0xff] %vm529_vm2, %v2109_v20  ;;  %v2107_v27 = vadd.f32 %v2091_v25, %v2052_v1  ;;  %1929 = vst.msk [vmem:[%s4310_s29 + $0x60] sm:$0xff] %vm529_vm2, %v1913_v23  ;;  %v1916_v29 = vadd.f32 %v3426_v37, %v1900_v26 }
 0x251   : > { %v2094_v61 = vld [vmem:[%s4310_s29 + $0x58] sm:$0xff]  ;;  %v1873_v31 = vpop.f32.mrf.mxu1  ;;  %v2286_v6 = vld [vmem:[%s4310_s29 + $0x20] sm:$0xff] }
 0x252   : > { %v2071_v32 = vpop.f32.mrf.mxu0  ;;  %2123 = vst.msk [vmem:[%s4310_s29 + $0x40] sm:$0xff] %vm529_vm2, %v2107_v27  ;;  %v2110_v34 = vadd.f32 %v3440_v4, %v2094_v61  ;;  %1932 = vst.msk [vmem:[%s4310_s29 + $0x78] sm:$0xff] %vm529_vm2, %v1916_v29  ;;  %v1914_v35 = vadd.f32 %v1898_v3, %v1873_v31 }
 0x253   : > { %v2092_v45 = vld [vmem:[%s4310_s29 + $0x48] sm:$0xff]  ;;  %v3449_v22 = vpop.f32.mrf.mxu1  ;;  %v2289_v9 = vld [vmem:[%s4310_s29 + $0x38] sm:$0xff] }
 0x254   : > { %v3467_v8 = vpop.f32.mrf.mxu0  ;;  %2126 = vst.msk [vmem:[%s4310_s29 + $0x58] sm:$0xff] %vm529_vm2, %v2110_v34  ;;  %v2108_v33 = vadd.f32 %v2092_v45, %v2055_v40  ;;  %1930 = vst.msk [vmem:[%s4310_s29 + $0x68] sm:$0xff] %vm529_vm2, %v1914_v35  ;;  %v2300_v36 = vadd.f32 %v3449_v22, %v2284_v59 }
 0x255   : > { %v2097_v41 = vld [vmem:[%s4310_s29 + $0x70] sm:$0xff]  ;;  %v2219_v16 = vpop.f32.mrf.mxu1  ;;  %v2287_v48 = vld [vmem:[%s4310_s29 + $0x28] sm:$0xff] }
 0x256   : > { %v2417_v49 = vpop.f32.mrf.mxu0  ;;  %2124 = vst.msk [vmem:[%s4310_s29 + $0x48] sm:$0xff] %vm529_vm2, %v2108_v33  ;;  %v2113_v50 = vadd.f32 %v3443_v14, %v2097_v41  ;;  %2316 = vst.msk [vmem:[%s4310_s29 + $0x10] sm:$0xff] %vm529_vm2, %v2300_v36  ;;  %v2298_v51 = vadd.f32 %v2282_v46, %v2219_v16 }
 0x257   : > { %v2095_v24 = vld [vmem:[%s4310_s29 + $0x60] sm:$0xff]  ;;  %v3450_v52 = vpop.f32.mrf.mxu1  ;;  %v2292_v20 = vld [vmem:[%s4310_s29 + $0x50] sm:$0xff] }
 0x258   : > { %v3468_v55 = vpop.f32.mrf.mxu0  ;;  %2129 = vst.msk [vmem:[%s4310_s29 + $0x70] sm:$0xff] %vm529_vm2, %v2113_v50  ;;  %v2111_v5 = vadd.f32 %v2095_v24, %v2068_v53  ;;  %2314 = vst.msk [vmem:[%s4310_s29] sm:$0xff] %vm529_vm2, %v2298_v51  ;;  %v2301_v30 = vadd.f32 %v3450_v52, %v2285_v54 }
 0x259   : > { %v2098_v56 = vld [vmem:[%s4310_s29 + $0x78] sm:$0xff]  ;;  %v2222_v57 = vpop.f32.mrf.mxu1  ;;  %v2290_v27 = vld [vmem:[%s4310_s29 + $0x40] sm:$0xff] }
 0x25a   : > { %v2420_v58 = vpop.f32.mrf.mxu0  ;;  %2127 = vst.msk [vmem:[%s4310_s29 + $0x60] sm:$0xff] %vm529_vm2, %v2111_v5  ;;  %v2114_v62 = vadd.f32 %v3444_v38, %v2098_v56  ;;  %2317 = vst.msk [vmem:[%s4310_s29 + $0x18] sm:$0xff] %vm529_vm2, %v2301_v30  ;;  %v2299_v63 = vadd.f32 %v2283_v42, %v2222_v57 }
 0x25b   : > { %v2096_v47 = vld [vmem:[%s4310_s29 + $0x68] sm:$0xff]  ;;  %v3453_v1 = vpop.f32.mrf.mxu1  ;;  %v2293_v34 = vld [vmem:[%s4310_s29 + $0x58] sm:$0xff] }
 0x25c   : > { %v3471_v60 = vpop.f32.mrf.mxu0  ;;  %2130 = vst.msk [vmem:[%s4310_s29 + $0x78] sm:$0xff] %vm529_vm2, %v2114_v62  ;;  %v2112_v0 = vadd.f32 %v2096_v47, %v2071_v32  ;;  %2315 = vst.msk [vmem:[%s4310_s29 + $0x8] sm:$0xff] %vm529_vm2, %v2299_v63  ;;  %v2304_v2 = vadd.f32 %v3453_v1, %v2288_v21 }
 0x25d   : > { %v2482_v39 = vld [vmem:[%s4310_s29 + $0x10] sm:$0xff]  ;;  %v2235_v4 = vpop.f32.mrf.mxu1  ;;  %v2291_v33 = vld [vmem:[%s4310_s29 + $0x48] sm:$0xff] }
 0x25e   : > { %v2433_v7 = vpop.f32.mrf.mxu0  ;;  %2128 = vst.msk [vmem:[%s4310_s29 + $0x68] sm:$0xff] %vm529_vm2, %v2112_v0  ;;  %v2498_v12 = vadd.f32 %v3467_v8, %v2482_v39  ;;  %2320 = vst.msk [vmem:[%s4310_s29 + $0x30] sm:$0xff] %vm529_vm2, %v2304_v2  ;;  %v2302_v44 = vadd.f32 %v2286_v6, %v2235_v4 }
 0x25f   : > { %v2480_v17 = vld [vmem:[%s4310_s29] sm:$0xff]  ;;  %v3454_v40 = vpop.f32.mrf.mxu1  ;;  %v2296_v50 = vld [vmem:[%s4310_s29 + $0x70] sm:$0xff] }
 0x260   : > { %v3472_v10 = vpop.f32.mrf.mxu0  ;;  %2514 = vst.msk [vmem:[%s4310_s29 + $0x10] sm:$0xff] %vm529_vm2, %v2498_v12  ;;  %v2496_v28 = vadd.f32 %v2480_v17, %v2417_v49  ;;  %2318 = vst.msk [vmem:[%s4310_s29 + $0x20] sm:$0xff] %vm529_vm2, %v2302_v44  ;;  %v2305_v11 = vadd.f32 %v3454_v40, %v2289_v9 }
 0x261   : > { %v2483_v13 = vld [vmem:[%s4310_s29 + $0x18] sm:$0xff]  ;;  %v2238_v14 = vpop.f32.mrf.mxu1 }
 0x262   : > { %v2436_v15 = vpop.f32.mrf.mxu0  ;;  %2512 = vst.msk [vmem:[%s4310_s29] sm:$0xff] %vm529_vm2, %v2496_v28  ;;  %v2499_v43 = vadd.f32 %v3468_v55, %v2483_v13  ;;  %2321 = vst.msk [vmem:[%s4310_s29 + $0x38] sm:$0xff] %vm529_vm2, %v2305_v11  ;;  %v2303_v18 = vadd.f32 %v2287_v48, %v2238_v14  ;;  %v2294_v55 = vld [vmem:[%s4310_s29 + $0x60] sm:$0xff] }
 0x263   : > { %v2481_v19 = vld [vmem:[%s4310_s29 + $0x8] sm:$0xff]  ;;  %v3457_v53 = vpop.f32.mrf.mxu1 }
 0x264   : > { %v3475_v23 = vpop.f32.mrf.mxu0  ;;  %2515 = vst.msk [vmem:[%s4310_s29 + $0x18] sm:$0xff] %vm529_vm2, %v2499_v43  ;;  %v2497_v25 = vadd.f32 %v2481_v19, %v2420_v58  ;;  %2319 = vst.msk [vmem:[%s4310_s29 + $0x28] sm:$0xff] %vm529_vm2, %v2303_v18  ;;  %v2308_v37 = vadd.f32 %v3457_v53, %v2292_v20  ;;  %v2297_v58 = vld [vmem:[%s4310_s29 + $0x78] sm:$0xff] }
 0x265   : > { %v2486_v26 = vld [vmem:[%s4310_s29 + $0x30] sm:$0xff]  ;;  %v2251_v38 = vpop.f32.mrf.mxu1  ;;  %v2295_v21 = vld [vmem:[%s4310_s29 + $0x68] sm:$0xff] }
 0x266   : > { %v2449_v29 = vpop.f32.mrf.mxu0  ;;  %2513 = vst.msk [vmem:[%s4310_s29 + $0x8] sm:$0xff] %vm529_vm2, %v2497_v25  ;;  %v2502_v61 = vadd.f32 %v3471_v60, %v2486_v26  ;;  %2324 = vst.msk [vmem:[%s4310_s29 + $0x50] sm:$0xff] %vm529_vm2, %v2308_v37  ;;  %v2306_v31 = vadd.f32 %v2290_v27, %v2251_v38  ;;  %v4689_v37 = vld [vmem:[%s4920_s7] ss:$0 sm:$0xff] }
 0x267   : > { %v2484_v3 = vld [vmem:[%s4310_s29 + $0x20] sm:$0xff]  ;;  %v3458_v32 = vpop.f32.mrf.mxu1  ;;  %v2680_v6 = vld [vmem:[%s4310_s29 + $0x10] sm:$0xff] }
 0x268   : > { %v3476_v35 = vpop.f32.mrf.mxu0  ;;  %2518 = vst.msk [vmem:[%s4310_s29 + $0x30] sm:$0xff] %vm529_vm2, %v2502_v61  ;;  %v2500_v45 = vadd.f32 %v2484_v3, %v2433_v7  ;;  %2322 = vst.msk [vmem:[%s4310_s29 + $0x40] sm:$0xff] %vm529_vm2, %v2306_v31  ;;  %v2309_v22 = vadd.f32 %v3458_v32, %v2293_v34  ;;  %v4700_v31 = vld [vmem:[%s4921_s8] ss:$0 sm:$0xff] }
 0x269   : > { %v2487_v59 = vld [vmem:[%s4310_s29 + $0x38] sm:$0xff]  ;;  %v2254_v8 = vpop.f32.mrf.mxu1  ;;  %v2678_v40 = vld [vmem:[%s4310_s29] sm:$0xff] }
 0x26a   : > { %2516 = vst.msk [vmem:[%s4310_s29 + $0x20] sm:$0xff] %vm529_vm2, %v2500_v45  ;;  %v2503_v36 = vadd.f32 %v3472_v10, %v2487_v59  ;;  %2325 = vst.msk [vmem:[%s4310_s29 + $0x58] sm:$0xff] %vm529_vm2, %v2309_v22  ;;  %v2307_v41 = vadd.f32 %v2291_v33, %v2254_v8  ;;  %v2452_v46 = vpop.f32.mrf.mxu0 }
 0x26b   : > { %v2485_v16 = vld [vmem:[%s4310_s29 + $0x28] sm:$0xff]  ;;  %v3461_v49 = vpop.f32.mrf.mxu1  ;;  %v2681_v14 = vld [vmem:[%s4310_s29 + $0x18] sm:$0xff] }
 0x26c   : > { %2519 = vst.msk [vmem:[%s4310_s29 + $0x38] sm:$0xff] %vm529_vm2, %v2503_v36  ;;  %v2501_v51 = vadd.f32 %v2485_v16, %v2436_v15  ;;  %2323 = vst.msk [vmem:[%s4310_s29 + $0x48] sm:$0xff] %vm529_vm2, %v2307_v41  ;;  %v2312_v24 = vadd.f32 %v3461_v49, %v2296_v50  ;;  %v3479_v57 = vpop.f32.mrf.mxu0 }
 0x26d   : > { %v2490_v52 = vld [vmem:[%s4310_s29 + $0x50] sm:$0xff]  ;;  %v2267_v54 = vpop.f32.mrf.mxu1  ;;  %v2679_v19 = vld [vmem:[%s4310_s29 + $0x8] sm:$0xff] }
 0x26e   : > { %2517 = vst.msk [vmem:[%s4310_s29 + $0x28] sm:$0xff] %vm529_vm2, %v2501_v51  ;;  %v2506_v5 = vadd.f32 %v3475_v23, %v2490_v52  ;;  %2328 = vst.msk [vmem:[%s4310_s29 + $0x70] sm:$0xff] %vm529_vm2, %v2312_v24  ;;  %v2310_v30 = vadd.f32 %v2294_v55, %v2267_v54  ;;  %v2465_v39 = vpop.f32.mrf.mxu0 }
 0x26f   : > { %v2488_v56 = vld [vmem:[%s4310_s29 + $0x40] sm:$0xff]  ;;  %v3462_v42 = vpop.f32.mrf.mxu1  ;;  %v2684_v38 = vld [vmem:[%s4310_s29 + $0x30] sm:$0xff] }
 0x270   : > { %2522 = vst.msk [vmem:[%s4310_s29 + $0x50] sm:$0xff] %vm529_vm2, %v2506_v5  ;;  %v2504_v62 = vadd.f32 %v2488_v56, %v2449_v29  ;;  %2326 = vst.msk [vmem:[%s4310_s29 + $0x60] sm:$0xff] %vm529_vm2, %v2310_v30  ;;  %v2313_v63 = vadd.f32 %v3462_v42, %v2297_v58  ;;  %v3480_v11 = vpop.f32.mrf.mxu0 }
 0x271   : > { %v2491_v47 = vld [vmem:[%s4310_s29 + $0x58] sm:$0xff]  ;;  %v2270_v1 = vpop.f32.mrf.mxu1  ;;  %v2682_v32 = vld [vmem:[%s4310_s29 + $0x20] sm:$0xff] }
 0x272   : > { %2520 = vst.msk [vmem:[%s4310_s29 + $0x40] sm:$0xff] %vm529_vm2, %v2504_v62  ;;  %v2507_v60 = vadd.f32 %v3476_v35, %v2491_v47  ;;  %2329 = vst.msk [vmem:[%s4310_s29 + $0x78] sm:$0xff] %vm529_vm2, %v2313_v63  ;;  %v2311_v0 = vadd.f32 %v2295_v21, %v2270_v1  ;;  %v2468_v23 = vpop.f32.mrf.mxu0 }
 0x273   : > { %v2489_v2 = vld [vmem:[%s4310_s29 + $0x48] sm:$0xff]  ;;  %v3485_v4 = vpop.f32.mrf.mxu1  ;;  %v2685_v59 = vld [vmem:[%s4310_s29 + $0x38] sm:$0xff] }
 0x274   : > { %2523 = vst.msk [vmem:[%s4310_s29 + $0x58] sm:$0xff] %vm529_vm2, %v2507_v60  ;;  %v2505_v7 = vadd.f32 %v2489_v2, %v2452_v46  ;;  %2327 = vst.msk [vmem:[%s4310_s29 + $0x68] sm:$0xff] %vm529_vm2, %v2311_v0  ;;  %v2696_v12 = vadd.f32 %v3485_v4, %v2680_v6 }
 0x275   : > { %v2494_v44 = vld [vmem:[%s4310_s29 + $0x70] sm:$0xff]  ;;  %v2615_v17 = vpop.f32.mrf.mxu1  ;;  %v2683_v46 = vld [vmem:[%s4310_s29 + $0x28] sm:$0xff] }
 0x276   : > { %2521 = vst.msk [vmem:[%s4310_s29 + $0x48] sm:$0xff] %vm529_vm2, %v2505_v7  ;;  %v2510_v9 = vadd.f32 %v3479_v57, %v2494_v44  ;;  %2712 = vst.msk [vmem:[%s4310_s29 + $0x10] sm:$0xff] %vm529_vm2, %v2696_v12  ;;  %v2694_v10 = vadd.f32 %v2678_v40, %v2615_v17 }
 0x277   : > { %v2492_v28 = vld [vmem:[%s4310_s29 + $0x60] sm:$0xff]  ;;  %v3486_v13 = vpop.f32.mrf.mxu1  ;;  %v2688_v57 = vld [vmem:[%s4310_s29 + $0x50] sm:$0xff] }
 0x278   : > { %2526 = vst.msk [vmem:[%s4310_s29 + $0x70] sm:$0xff] %vm529_vm2, %v2510_v9  ;;  %v2508_v48 = vadd.f32 %v2492_v28, %v2465_v39  ;;  %2710 = vst.msk [vmem:[%s4310_s29] sm:$0xff] %vm529_vm2, %v2694_v10  ;;  %v2697_v15 = vadd.f32 %v3486_v13, %v2681_v14 }
 0x279   : > { %v2495_v43 = vld [vmem:[%s4310_s29 + $0x78] sm:$0xff]  ;;  %v2618_v18 = vpop.f32.mrf.mxu1  ;;  %v2686_v21 = vld [vmem:[%s4310_s29 + $0x40] sm:$0xff] }
 0x27a   : > { %2524 = vst.msk [vmem:[%s4310_s29 + $0x60] sm:$0xff] %vm529_vm2, %v2508_v48  ;;  %v2511_v53 = vadd.f32 %v3480_v11, %v2495_v43  ;;  %2713 = vst.msk [vmem:[%s4310_s29 + $0x18] sm:$0xff] %vm529_vm2, %v2697_v15  ;;  %v2695_v20 = vadd.f32 %v2679_v19, %v2618_v18 }
 0x27b   : > { %v2493_v25 = vld [vmem:[%s4310_s29 + $0x68] sm:$0xff]  ;;  %v3489_v26 = vpop.f32.mrf.mxu1  ;;  %v2689_v12 = vld [vmem:[%s4310_s29 + $0x58] sm:$0xff] }
 0x27c   : > { %2527 = vst.msk [vmem:[%s4310_s29 + $0x78] sm:$0xff] %vm529_vm2, %v2511_v53  ;;  %v2509_v27 = vadd.f32 %v2493_v25, %v2468_v23  ;;  %2711 = vst.msk [vmem:[%s4310_s29 + $0x8] sm:$0xff] %vm529_vm2, %v2695_v20  ;;  %v2700_v29 = vadd.f32 %v3489_v26, %v2684_v38 }
 0x27d   : > { %v2728_v61 = vld [vmem:[%s4310_s29 + $0x10] sm:$0xff]  ;;  %v2631_v3 = vpop.f32.mrf.mxu1  ;;  %v2687_v13 = vld [vmem:[%s4310_s29 + $0x48] sm:$0xff] }
 0x27e   : > { %2525 = vst.msk [vmem:[%s4310_s29 + $0x68] sm:$0xff] %vm529_vm2, %v2509_v27  ;;  %v2751_v34 = vmul.f32 %v4689_v37, %v2728_v61  ;;  %2716 = vst.msk [vmem:[%s4310_s29 + $0x30] sm:$0xff] %vm529_vm2, %v2700_v29  ;;  %v2698_v35 = vadd.f32 %v2682_v32, %v2631_v3 }
 0x27f   : > { %v2726_v45 = vld [vmem:[%s4310_s29] sm:$0xff]  ;;  %v3490_v22 = vpop.f32.mrf.mxu1  ;;  %v2692_v20 = vld [vmem:[%s4310_s29 + $0x70] sm:$0xff] }
 0x280   : > { %v4711_v8 = vadd.f32 %v4700_v31, %v2751_v34  ;;  %v2749_v33 = vmul.f32 %v4689_v37, %v2726_v45  ;;  %2714 = vst.msk [vmem:[%s4310_s29 + $0x20] sm:$0xff] %vm529_vm2, %v2698_v35  ;;  %v2701_v36 = vadd.f32 %v3490_v22, %v2685_v59 }
 0x281   : > { %v2729_v41 = vld [vmem:[%s4310_s29 + $0x18] sm:$0xff]  ;;  %v2634_v16 = vpop.f32.mrf.mxu1  ;;  %v2690_v38 = vld [vmem:[%s4310_s29 + $0x60] sm:$0xff] }
 0x282   : > { %v2790_v49 = vsub.f32 0.0, %v4711_v8  ;;  %v4720_v50 = vadd.f32 %v4700_v31, %v2749_v33  ;;  %v2752_v51 = vmul.f32 %v4689_v37, %v2729_v41  ;;  %2717 = vst.msk [vmem:[%s4310_s29 + $0x38] sm:$0xff] %vm529_vm2, %v2701_v36  ;;  %v2699_v24 = vadd.f32 %v2683_v46, %v2634_v16 }
 0x283   : > { %v2727_v52 = vld [vmem:[%s4310_s29 + $0x8] sm:$0xff]  ;;  %v3493_v54 = vpop.f32.mrf.mxu1  ;;  %v2693_v45 = vld [vmem:[%s4310_s29 + $0x78] sm:$0xff] }
 0x284   : > { %v2808_v55 = vmul.f32 1.442695, %v2790_v49  ;;  %v2788_v5 = vsub.f32 0.0, %v4720_v50  ;;  %v4728_v30 = vadd.f32 %v4700_v31, %v2752_v51  ;;  %v2750_v56 = vmul.f32 %v4689_v37, %v2727_v52  ;;  %2715 = vst.msk [vmem:[%s4310_s29 + $0x28] sm:$0xff] %vm529_vm2, %v2699_v24 }
 0x285   : > { %v2732_v42 = vld [vmem:[%s4310_s29 + $0x30] sm:$0xff]  ;;  %v2704_v58 = vadd.f32 %v3493_v54, %v2688_v57  ;;  %v2647_v62 = vpop.f32.mrf.mxu1  ;;  %v2691_v49 = vld [vmem:[%s4310_s29 + $0x68] sm:$0xff] }
 0x286   : > { %3631 = vpow2.f32 %v2808_v55  ;;  %v2804_v63 = vmul.f32 1.442695, %v2788_v5  ;;  %v2791_v47 = vsub.f32 0.0, %v4728_v30  ;;  %v4737_v1 = vadd.f32 %v4700_v31, %v2750_v56 }
 0x287   : > { %v2755_v60 = vmul.f32 %v4689_v37, %v2732_v42  ;;  %v2730_v0 = vld [vmem:[%s4310_s29 + $0x20] sm:$0xff]  ;;  %2720 = vst.msk [vmem:[%s4310_s29 + $0x50] sm:$0xff] %vm529_vm2, %v2704_v58  ;;  %v2702_v2 = vadd.f32 %v2686_v21, %v2647_v62  ;;  %v3494_v39 = vpop.f32.mrf.mxu1 }
 0x288   : > { %3633 = vpow2.f32 %v2804_v63  ;;  %v2810_v4 = vmul.f32 1.442695, %v2791_v47  ;;  %v2789_v6 = vsub.f32 0.0, %v4737_v1  ;;  %v2753_v7 = vmul.f32 %v4689_v37, %v2730_v0 }
 0x289   : > { %v4748_v44 = vadd.f32 %v4700_v31, %v2755_v60  ;;  %v2733_v17 = vld [vmem:[%s4310_s29 + $0x38] sm:$0xff]  ;;  %2718 = vst.msk [vmem:[%s4310_s29 + $0x40] sm:$0xff] %vm529_vm2, %v2702_v2  ;;  %v2705_v40 = vadd.f32 %v3494_v39, %v2689_v12  ;;  %v2650_v9 = vpop.f32.mrf.mxu1 }
 0x28a   : > { %3635 = vpow2.f32 %v2810_v4  ;;  %v2806_v10 = vmul.f32 1.442695, %v2789_v6  ;;  %v4754_v28 = vadd.f32 %v4700_v31, %v2753_v7  ;;  %v2756_v11 = vmul.f32 %v4689_v37, %v2733_v17 }
 0x28b   : > { %v2794_v14 = vsub.f32 0.0, %v4748_v44  ;;  %v2731_v48 = vld [vmem:[%s4310_s29 + $0x28] sm:$0xff]  ;;  %2721 = vst.msk [vmem:[%s4310_s29 + $0x58] sm:$0xff] %vm529_vm2, %v2705_v40  ;;  %v2703_v15 = vadd.f32 %v2687_v13, %v2650_v9  ;;  %v3497_v43 = vpop.f32.mrf.mxu1 }
 0x28c   : > { %3637 = vpow2.f32 %v2806_v10  ;;  %v2792_v18 = vsub.f32 0.0, %v4754_v28  ;;  %v4764_v19 = vadd.f32 %v4700_v31, %v2756_v11  ;;  %v2754_v53 = vmul.f32 %v4689_v37, %v2731_v48 }
 0x28d   : > { %v2816_v23 = vmul.f32 1.442695, %v2794_v14  ;;  %2719 = vst.msk [vmem:[%s4310_s29 + $0x48] sm:$0xff] %vm529_vm2, %v2703_v15  ;;  %v2708_v25 = vadd.f32 %v3497_v43, %v2692_v20  ;;  %v2663_v26 = vpop.f32.mrf.mxu1 }
 0x28e   : > { %v2812_v27 = vmul.f32 1.442695, %v2792_v18  ;;  %v2795_v29 = vsub.f32 0.0, %v4764_v19  ;;  %v4773_v61 = vadd.f32 %v4700_v31, %v2754_v53  ;;  %v2736_v3 = vld [vmem:[%s4310_s29 + $0x50] sm:$0xff]  ;;  %v2706_v32 = vadd.f32 %v2690_v38, %v2663_v26 }
 0x28f   : > { %3639 = vpow2.f32 %v2816_v23  ;;  %v2759_v34 = vmul.f32 %v4689_v37, %v2736_v3  ;;  %2724 = vst.msk [vmem:[%s4310_s29 + $0x70] sm:$0xff] %vm529_vm2, %v2708_v25  ;;  %v3498_v35 = vpop.f32.mrf.mxu1 }
 0x290   : > { %3641 = vpow2.f32 %v2812_v27  ;;  %v2818_v22 = vmul.f32 1.442695, %v2795_v29  ;;  %v2793_v59 = vsub.f32 0.0, %v4773_v61  ;;  %v2734_v33 = vld [vmem:[%s4310_s29 + $0x40] sm:$0xff]  ;;  %2722 = vst.msk [vmem:[%s4310_s29 + $0x60] sm:$0xff] %vm529_vm2, %v2706_v32  ;;  %v2709_v36 = vadd.f32 %v3498_v35, %v2693_v45 }
 0x291   : > { %v4785_v41 = vadd.f32 %v4700_v31, %v2759_v34  ;;  %v2757_v16 = vmul.f32 %v4689_v37, %v2734_v33  ;;  %v2666_v46 = vpop.f32.mrf.mxu1 }
 0x292   : > { %3643 = vpow2.f32 %v2818_v22  ;;  %v2814_v51 = vmul.f32 1.442695, %v2793_v59  ;;  %v2737_v24 = vld [vmem:[%s4310_s29 + $0x58] sm:$0xff]  ;;  %2725 = vst.msk [vmem:[%s4310_s29 + $0x78] sm:$0xff] %vm529_vm2, %v2709_v36  ;;  %v2707_v52 = vadd.f32 %v2691_v49, %v2666_v46 }
 0x293   : > { %v3632_v54 = vpop.eup %3631  ;;  %v2798_v55 = vsub.f32 0.0, %v4785_v41  ;;  %v4794_v5 = vadd.f32 %v4700_v31, %v2757_v16  ;;  %v2760_v56 = vmul.f32 %v4689_v37, %v2737_v24 }
 0x294   : > { %v2838_v57 = vadd.f32 1.0, %v3632_v54  ;;  %3645 = vpow2.f32 %v2814_v51  ;;  %v2735_v42 = vld [vmem:[%s4310_s29 + $0x48] sm:$0xff]  ;;  %2723 = vst.msk [vmem:[%s4310_s29 + $0x68] sm:$0xff] %vm529_vm2, %v2707_v52  ;;  %v2884_v54 = vld [vmem:[%s3847_s28] sm:$0xff] }
 0x295   : > { %v3634_v58 = vpop.eup %3633  ;;  %v2824_v62 = vmul.f32 1.442695, %v2798_v55  ;;  %v2796_v63 = vsub.f32 0.0, %v4794_v5  ;;  %v4802_v47 = vadd.f32 %v4700_v31, %v2760_v56  ;;  %v2758_v21 = vmul.f32 %v4689_v37, %v2735_v42 }
 0x296   : > { %3647 = vrcp.f32 %v2838_v57  ;;  %v2836_v60 = vadd.f32 1.0, %v3634_v58  ;;  %v2740_v0 = vld [vmem:[%s4310_s29 + $0x70] sm:$0xff] }
 0x297   : > { %v3636_v2 = vpop.eup %3635  ;;  %3649 = vpow2.f32 %v2824_v62  ;;  %v2820_v39 = vmul.f32 1.442695, %v2796_v63  ;;  %v2799_v4 = vsub.f32 0.0, %v4802_v47  ;;  %v4808_v6 = vadd.f32 %v4700_v31, %v2758_v21  ;;  %v2738_v7 = vld [vmem:[%s4310_s29 + $0x60] sm:$0xff]  ;;  %v2887_v62 = vld [vmem:[%s3847_s28 + $0x18] sm:$0xff] }
 0x298   : > { %3651 = vrcp.f32 %v2836_v60  ;;  %v2839_v12 = vadd.f32 1.0, %v3636_v2  ;;  %v2763_v17 = vmul.f32 %v4689_v37, %v2740_v0  ;;  %v2761_v40 = vmul.f32 %v4689_v37, %v2738_v7  ;;  %v2885_v2 = vld [vmem:[%s3847_s28 + $0x8] sm:$0xff] }
 0x299   : > { %v3638_v9 = vpop.eup %3637  ;;  %3653 = vpow2.f32 %v2820_v39  ;;  %v2826_v10 = vmul.f32 1.442695, %v2799_v4  ;;  %v2797_v11 = vsub.f32 0.0, %v4808_v6  ;;  %v2741_v13 = vld [vmem:[%s4310_s29 + $0x78] sm:$0xff] }
 0x29a   : > { %3655 = vrcp.f32 %v2839_v12  ;;  %v2837_v14 = vadd.f32 1.0, %v3638_v9  ;;  %v4816_v48 = vadd.f32 %v4700_v31, %v2763_v17  ;;  %v4819_v15 = vadd.f32 %v4700_v31, %v2761_v40 }
 0x29b   : > { %3657 = vpow2.f32 %v2826_v10  ;;  %v2822_v43 = vmul.f32 1.442695, %v2797_v11  ;;  %v2764_v18 = vmul.f32 %v4689_v37, %v2741_v13  ;;  %v2739_v53 = vld [vmem:[%s4310_s29 + $0x68] sm:$0xff]  ;;  %v2888_v11 = vld [vmem:[%s3847_s28 + $0x20] sm:$0xff] }
 0x29c   : > { %v3640_v20 = vpop.eup %3639  ;;  %3659 = vrcp.f32 %v2837_v14  ;;  %v2802_v23 = vsub.f32 0.0, %v4816_v48  ;;  %v2800_v25 = vsub.f32 0.0, %v4819_v15  ;;  %v2762_v26 = vmul.f32 %v4689_v37, %v2739_v53 }
 0x29d   : > { %v3642_v38 = vpop.eup %3641  ;;  %v2842_v27 = vadd.f32 1.0, %v3640_v20  ;;  %3661 = vpow2.f32 %v2822_v43  ;;  %v4827_v29 = vadd.f32 %v4700_v31, %v2764_v18  ;;  %v2891_v18 = vld [vmem:[%s3847_s28 + $0x38] sm:$0xff] }
 0x29e   : > { %v2840_v3 = vadd.f32 1.0, %v3642_v38  ;;  %v2832_v32 = vmul.f32 1.442695, %v2802_v23  ;;  %v4830_v34 = vadd.f32 %v4700_v31, %v2762_v26  ;;  %v2828_v45 = vmul.f32 1.442695, %v2800_v25  ;;  %v2886_v31 = vld [vmem:[%s3847_s28 + $0x10] sm:$0xff] }
 0x29f   : > { %v3644_v35 = vpop.eup %3643  ;;  %3663 = vrcp.f32 %v2842_v27  ;;  %v2803_v22 = vsub.f32 0.0, %v4827_v29 }
 0x2a0   : > { %3665 = vrcp.f32 %v2840_v3  ;;  %v2843_v37 = vadd.f32 1.0, %v3644_v35  ;;  %v2801_v59 = vsub.f32 0.0, %v4830_v34 }
 0x2a1   : > { %v3646_v33 = vpop.eup %3645  ;;  %3667 = vpow2.f32 %v2832_v32  ;;  %v2834_v36 = vmul.f32 1.442695, %v2803_v22  ;;  %v2894_v22 = vld [vmem:[%s3847_s28 + $0x50] sm:$0xff] }
 0x2a2   : > { %3669 = vrcp.f32 %v2843_v37  ;;  %v2841_v16 = vadd.f32 1.0, %v3646_v33  ;;  %v2830_v46 = vmul.f32 1.442695, %v2801_v59 }
 0x2a3   : > { %v3648_v49 = vpop.eup %3647  ;;  %3671 = vpow2.f32 %v2828_v45 }
 0x2a4   : > { %v3650_v51 = vpop.eup %3649  ;;  %v2870_v24 = vmul.f32 %v3648_v49, %v4711_v8  ;;  %3673 = vrcp.f32 %v2841_v16  ;;  %v2895_v49 = vld [vmem:[%s3847_s28 + $0x58] sm:$0xff] }
 0x2a5   : > { %v3652_v52 = vpop.eup %3651  ;;  %v2846_v55 = vadd.f32 1.0, %v3650_v51  ;;  %3675 = vpow2.f32 %v2834_v36 }
 0x2a6   : > { %v3654_v56 = vpop.eup %3653  ;;  %v2902_v57 = vadd.f32 %v2886_v31, %v2870_v24  ;;  %v2868_v42 = vmul.f32 %v3652_v52, %v4720_v50  ;;  %3677 = vpow2.f32 %v2830_v46  ;;  %v2893_v24 = vld [vmem:[%s3847_s28 + $0x48] sm:$0xff] }
 0x2a7   : > { %v3656_v58 = vpop.eup %3655  ;;  %3679 = vrcp.f32 %v2846_v55  ;;  %v2844_v63 = vadd.f32 1.0, %v3654_v56  ;;  %v2898_v56 = vld [vmem:[%s3847_s28 + $0x70] sm:$0xff] }
 0x2a8   : > { %v3658_v21 = vpop.eup %3657  ;;  %2918 = vst.msk [vmem:[%s4310_s29 + $0x10] sm:$0xff] %vm529_vm2, %v2902_v57  ;;  %v2900_v8 = vadd.f32 %v2884_v54, %v2868_v42  ;;  %v2871_v60 = vmul.f32 %v3656_v58, %v4728_v30  ;;  %v2890_v30 = vld [vmem:[%s3847_s28 + $0x30] sm:$0xff]  ;;  %v2896_v42 = vld [vmem:[%s3847_s28 + $0x60] sm:$0xff] }
 0x2a9   : > { %v3660_v0 = vpop.eup %3659  ;;  %3681 = vrcp.f32 %v2844_v63  ;;  %v2847_v39 = vadd.f32 1.0, %v3658_v21 }
 0x2aa   : > { %v3662_v50 = vpop.eup %3661  ;;  %2916 = vst.msk [vmem:[%s4310_s29] sm:$0xff] %vm529_vm2, %v2900_v8  ;;  %v2903_v4 = vadd.f32 %v2887_v62, %v2871_v60  ;;  %v2869_v7 = vmul.f32 %v3660_v0, %v4737_v1  ;;  %v2897_v0 = vld [vmem:[%s3847_s28 + $0x68] sm:$0xff] }
 0x2ab   : > { %3683 = vrcp.f32 %v2847_v39  ;;  %v2845_v12 = vadd.f32 1.0, %v3662_v50 }
 0x2ac   : > { %v3664_v17 = vpop.eup %3663  ;;  %2919 = vst.msk [vmem:[%s4310_s29 + $0x18] sm:$0xff] %vm529_vm2, %v2903_v4  ;;  %v2901_v40 = vadd.f32 %v2885_v2, %v2869_v7 }
 0x2ad   : > { %v3666_v9 = vpop.eup %3665  ;;  %v2874_v10 = vmul.f32 %v3664_v17, %v4748_v44  ;;  %3685 = vrcp.f32 %v2845_v12  ;;  %v2889_v44 = vld [vmem:[%s3847_s28 + $0x28] sm:$0xff] }
 0x2ae   : > { %v3668_v13 = vpop.eup %3667  ;;  %2917 = vst.msk [vmem:[%s4310_s29 + $0x8] sm:$0xff] %vm529_vm2, %v2901_v40  ;;  %v2872_v1 = vmul.f32 %v3666_v9, %v4754_v28 }
 0x2af   : > { %v3670_v14 = vpop.eup %3669  ;;  %v2906_v43 = vadd.f32 %v2890_v30, %v2874_v10  ;;  %v2850_v53 = vadd.f32 1.0, %v3668_v13 }
 0x2b0   : > { %v3672_v20 = vpop.eup %3671  ;;  %v2904_v23 = vadd.f32 %v2888_v11, %v2872_v1  ;;  %v2875_v25 = vmul.f32 %v3670_v14, %v4764_v19 }
 0x2b1   : > { %v3674_v26 = vpop.eup %3673  ;;  %2922 = vst.msk [vmem:[%s4310_s29 + $0x30] sm:$0xff] %vm529_vm2, %v2906_v43  ;;  %3687 = vrcp.f32 %v2850_v53  ;;  %v2848_v38 = vadd.f32 1.0, %v3672_v20 }
 0x2b2   : > { %v3676_v27 = vpop.eup %3675  ;;  %2920 = vst.msk [vmem:[%s4310_s29 + $0x20] sm:$0xff] %vm529_vm2, %v2904_v23  ;;  %v2907_v28 = vadd.f32 %v2891_v18, %v2875_v25  ;;  %v2873_v3 = vmul.f32 %v3674_v26, %v4773_v61  ;;  %v2892_v61 = vld [vmem:[%s3847_s28 + $0x40] sm:$0xff] }
 0x2b3   : > { %v3678_v32 = vpop.eup %3677  ;;  %3689 = vrcp.f32 %v2848_v38  ;;  %v2851_v35 = vadd.f32 1.0, %v3676_v27 }
 0x2b4   : > { %v3680_v19 = vpop.eup %3679  ;;  %2923 = vst.msk [vmem:[%s4310_s29 + $0x38] sm:$0xff] %vm529_vm2, %v2907_v28  ;;  %v2905_v45 = vadd.f32 %v2889_v44, %v2873_v3  ;;  %v2849_v37 = vadd.f32 1.0, %v3678_v32 }
 0x2b5   : > { %v2878_v59 = vmul.f32 %v3680_v19, %v4785_v41  ;;  %3691 = vrcp.f32 %v2851_v35 }
 0x2b6   : > { %v3682_v33 = vpop.eup %3681  ;;  %2921 = vst.msk [vmem:[%s4310_s29 + $0x28] sm:$0xff] %vm529_vm2, %v2905_v45  ;;  %3693 = vrcp.f32 %v2849_v37 }
 0x2b7   : > { %v2910_v36 = vadd.f32 %v2894_v22, %v2878_v59  ;;  %v2876_v16 = vmul.f32 %v3682_v33, %v4794_v5 }
 0x2b8   : > { %v3684_v46 = vpop.eup %3683 }
 0x2b9   : > { %2926 = vst.msk [vmem:[%s4310_s29 + $0x50] sm:$0xff] %vm529_vm2, %v2910_v36  ;;  %v2908_v31 = vadd.f32 %v2892_v61, %v2876_v16  ;;  %v2879_v41 = vmul.f32 %v3684_v46, %v4802_v47 }
 0x2ba   : > { %v3686_v51 = vpop.eup %3685 }
 0x2bb   : > { %2924 = vst.msk [vmem:[%s4310_s29 + $0x40] sm:$0xff] %vm529_vm2, %v2908_v31  ;;  %v2911_v52 = vadd.f32 %v2895_v49, %v2879_v41  ;;  %v2877_v54 = vmul.f32 %v3686_v51, %v4808_v6  ;;  %v2899_v6 = vld [vmem:[%s3847_s28 + $0x78] sm:$0xff] }
 0x2bd   : > { %2927 = vst.msk [vmem:[%s4310_s29 + $0x58] sm:$0xff] %vm529_vm2, %v2911_v52  ;;  %v2909_v5 = vadd.f32 %v2893_v24, %v2877_v54 }
 0x2be   : > { %v3688_v55 = vpop.eup %3687 }
 0x2bf   : > { %2925 = vst.msk [vmem:[%s4310_s29 + $0x48] sm:$0xff] %vm529_vm2, %v2909_v5  ;;  %v2882_v47 = vmul.f32 %v3688_v55, %v4816_v48 }
 0x2c0   : > { %v3690_v57 = vpop.eup %3689 }
 0x2c1   : > { %v2914_v58 = vadd.f32 %v2898_v56, %v2882_v47  ;;  %v2880_v62 = vmul.f32 %v3690_v57, %v4819_v15 }
 0x2c2   : > { %v3692_v63 = vpop.eup %3691 }
 0x2c3   : > { %v3694_v21 = vpop.eup %3693  ;;  %2930 = vst.msk [vmem:[%s4310_s29 + $0x70] sm:$0xff] %vm529_vm2, %v2914_v58  ;;  %v2912_v8 = vadd.f32 %v2896_v42, %v2880_v62  ;;  %v2883_v60 = vmul.f32 %v3692_v63, %v4827_v29 }
 0x2c4   : > { %v2881_v2 = vmul.f32 %v3694_v21, %v4830_v34 }
 0x2c5   : > { %2928 = vst.msk [vmem:[%s4310_s29 + $0x60] sm:$0xff] %vm529_vm2, %v2912_v8  ;;  %v2915_v48 = vadd.f32 %v2899_v6, %v2883_v60 }
 0x2c6   : > { %v2913_v39 = vadd.f32 %v2897_v0, %v2881_v2 }
 0x2c7   : > { %2931 = vst.msk [vmem:[%s4310_s29 + $0x78] sm:$0xff] %vm529_vm2, %v2915_v48 }
 0x2c8   : > { %2929 = vst.msk [vmem:[%s4310_s29 + $0x68] sm:$0xff] %vm529_vm2, %v2913_v39 }
 0x2c9 PF: > { %s19_s13 = sadd.s32 1, %s3733_s13   ;;  %s4924_s30 = smov %s3725_s11 }
 0x2ca   : > { %p16_p12 = scmp.ge.s32.totalorder %s19_s13, 6   ;;  %s4925_s10 = smov %s3729_s12 }
 0x2cb   : > { %s4926_s11 = smov %s4929_s14  ;;  %s4927_s12 = smov %s4933_s15 }
 0x2cc   :  { %18 = sbr.rel (!%p16_p12) target bundleno = 3 (0x3), region = 103 }

</bundles_post_ra>
